<compile_context>
chip_gen: v5e
topology: v5e:2x2
jax: 0.10.0
libtpu: 0.0.40
codegen_flags: <defaults>
</compile_context>

<pallas_src>
import math
import functools

import jax
import jax.numpy as jnp
import numpy as np
from jax.experimental import pallas as pl
from jax.experimental.pallas import tpu as pltpu


# ----------------------------- Pallas kernel ------------------------------ #

def _layernorm(y, gamma, beta, eps=1e-5):
    m = jnp.mean(y, axis=-1, keepdims=True)
    var = jnp.mean((y - m) ** 2, axis=-1, keepdims=True)
    return (y - m) * jax.lax.rsqrt(var + eps) * gamma + beta


def encoder_stack_kernel(x_ref, wqkv_ref, wo_ref, w1_ref, w2_ref, vec_ref,
                         o_ref, carry_ref, *, num_heads):
    """One grid step = one (Nb, S, E) batch block x one encoder layer.

    Grid = (batch_blocks, depth).  The activation is resident in `carry_ref`
    (VMEM scratch) across the whole layer axis; x_ref is read only at layer 0
    and o_ref is written only at the last layer.
    """
    Nb, S, E = x_ref.shape
    M2 = Nb * S
    H = num_heads
    Dh = E // H
    Mff = w1_ref.shape[1]
    scale = 1.0 / math.sqrt(Dh)
    bf16 = jnp.bfloat16

    layer = pl.program_id(1)
    n_layers = pl.num_programs(1)

    # Seed the resident activation on the first layer of this batch block.
    @pl.when(layer == 0)
    def _():
        carry_ref[...] = x_ref[...]

    # packed bias / LayerNorm-parameter slab (f32)
    bqkv = vec_ref[0:1, :3 * E]
    b1   = vec_ref[1:2, :Mff]
    bo   = vec_ref[2:3, :E]
    b2   = vec_ref[3:4, :E]
    g1   = vec_ref[4:5, :E]
    be1  = vec_ref[5:6, :E]
    g2   = vec_ref[6:7, :E]
    be2  = vec_ref[7:8, :E]

    # fold batch into the matmul M dimension
    x = carry_ref[...].reshape(M2, E)                  # f32 residual stream
    x_b = x.astype(bf16)

    # --- fused QKV projection (one MXU pass) ------------------------------ #
    qkv = jnp.dot(x_b, wqkv_ref[...],
                  preferred_element_type=jnp.float32) + bqkv     # (M2, 3E) f32

    q3 = qkv[:, :E].reshape(Nb, S, E)
    k3 = qkv[:, E:2 * E].reshape(Nb, S, E)
    v3 = qkv[:, 2 * E:].reshape(Nb, S, E)

    # heads become a leading batch dim: (H*Nb, S, Dh), head-major order
    def split_heads(t3):
        return jnp.concatenate(
            [t3[:, :, h * Dh:(h + 1) * Dh] for h in range(H)], axis=0)

    qh = split_heads(q3).astype(bf16)
    kh = split_heads(k3).astype(bf16)
    vh = split_heads(v3).astype(bf16)

    # --- attention: single batched dot over (batch*heads) ----------------- #
    s = jnp.einsum('bqd,bkd->bqk', qh, kh,
                   preferred_element_type=jnp.float32) * scale   # (H*Nb, S, S)
    s = s - jnp.max(s, axis=-1, keepdims=True)
    p = jnp.exp(s)
    p = p * pl.reciprocal(jnp.sum(p, axis=-1, keepdims=True), approx=True)
    ctx = jnp.einsum('bqk,bkd->bqd', p.astype(bf16), vh,
                     preferred_element_type=jnp.float32)         # (H*Nb, S, Dh)

    # reassemble heads along the lane (E) dimension -> (M2, E)
    attn = jnp.concatenate(
        [ctx[h * Nb:(h + 1) * Nb] for h in range(H)], axis=-1)   # (Nb, S, E)
    attn = attn.reshape(M2, E)

    attn = jnp.dot(attn.astype(bf16), wo_ref[...],
                   preferred_element_type=jnp.float32) + bo

    # --- residual + LayerNorm1 (post-norm) -------------------------------- #
    h1 = _layernorm(x + attn, g1, be1)

    # --- feed-forward (Linear -> ReLU -> Linear) --------------------------- #
    ff = jnp.dot(h1.astype(bf16), w1_ref[...],
                 preferred_element_type=jnp.float32) + b1
    ff = jnp.maximum(ff, 0.0)
    ff = jnp.dot(ff.astype(bf16), w2_ref[...],
                 preferred_element_type=jnp.float32) + b2

    # --- residual + LayerNorm2 -> carry; emit only at the last layer ------- #
    y = _layernorm(h1 + ff, g2, be2).reshape(Nb, S, E)
    carry_ref[...] = y

    @pl.when(layer == n_layers - 1)
    def _():
        o_ref[...] = y


# ------------------------- generation-aware planning ----------------------- #

def _vmem_capacity_bytes():
    try:
        info = pltpu.get_tpu_info()
        cap = int(getattr(info, "vmem_capacity_bytes", 0) or 0)
        if cap > 0:
            return cap
    except Exception:
        pass
    return 128 * 1024 * 1024


def _is_megacore():
    try:
        kind = jax.devices()[0].device_kind.lower()
    except Exception:
        return False
    return any(tag in kind for tag in ("v4", "v5p", "v7"))


def _plan(N, S, E, Mff, Wmax, H):
    """Pick the batch-block size Nb and a generation-aware VMEM limit."""
    cap = _vmem_capacity_bytes()
    megacore = _is_megacore()

    # Cap the scoped-VMEM request well below physical capacity (v7x: ~38 MiB,
    # v5e/v6e: ~77 MiB) and budget block choice at 85% of that.
    vmem_limit = int(min(cap * 0.6, 96 * 1024 * 1024))
    vmem_limit = max(vmem_limit, 32 * 1024 * 1024)
    budget = int(vmem_limit * 0.85)

    # per-layer constants (bf16 weights + f32 bias/LN slab), double-buffered
    const_bytes = 2 * (2 * (3 * E * E + E * E + 2 * E * Mff) + 4 * 8 * Wmax)

    def step_bytes(nb):
        m2 = nb * S
        act = 4 * nb * S * E * 4              # x (2 bufs) + out + carry scratch
        inter = (4 * m2 * 3 * E               # qkv f32
                 + 2 * 3 * m2 * E             # q/k/v bf16
                 + 6 * H * nb * S * S         # scores f32 + probs bf16
                 + 4 * m2 * E * 3             # ctx / attn / h1 f32
                 + 4 * m2 * Mff)              # ff intermediate f32
        return int((act + inter) * 1.5)       # headroom for compiler temps

    best = 1
    for nb in range(1, N + 1):
        if N % nb:
            continue
        if const_bytes + step_bytes(nb) > budget:
            continue
        # Keep >=2 batch blocks only where a 2nd TensorCore can use them.
        if megacore and N >= 2 and N // nb < 2:
            continue
        best = nb
    return best, vmem_limit


# ------------------------------- wrapper ----------------------------------- #

def transformer_encoder_pallas(x_sne, layer_params, num_heads):
    """x_sne: (S, N, E) — PyTorch batch_first=False layout."""
    x = jnp.transpose(x_sne, (1, 0, 2))       # -> (N, S, E)
    N, S, E = x.shape
    L = len(layer_params)
    Mff = layer_params[0]["w1"].shape[1]
    Wmax = layer_params[0]["vec"].shape[1]
    H = num_heads

    assert E % H == 0, "emb_size must be divisible by num_heads"
    assert E % 128 == 0 and Mff % 128 == 0, "E and mlp_dim must be multiples of 128"

    # stack per-layer params along a leading layer axis for the fused call
    stacked = {k: jnp.stack([lp[k] for lp in layer_params])
               for k in layer_params[0]}

    nb, vmem_limit = _plan(N, S, E, Mff, Wmax, H)
    assert N % nb == 0

    in_specs = [
        pl.BlockSpec((nb, S, E),      lambda b, l: (b, 0, 0)),   # activations
        pl.BlockSpec((None, E, 3 * E), lambda b, l: (l, 0, 0)),  # Wqkv (bf16)
        pl.BlockSpec((None, E, E),     lambda b, l: (l, 0, 0)),  # Wo   (bf16)
        pl.BlockSpec((None, E, Mff),   lambda b, l: (l, 0, 0)),  # W1   (bf16)
        pl.BlockSpec((None, Mff, E),   lambda b, l: (l, 0, 0)),  # W2   (bf16)
        pl.BlockSpec((None, 8, Wmax),  lambda b, l: (l, 0, 0)),  # bias/LN slab
    ]

    # advisory cost estimate for the XLA scheduler
    flops = L * (2 * N * S * (3 * E * E + E * E + 2 * E * Mff)
                 + 4 * N * S * S * E)
    transcendentals = L * N * H * S * S
    weight_bytes_per_layer = 2 * (3 * E * E + E * E + 2 * E * Mff) + 4 * 8 * Wmax
    bytes_accessed = (2 * N * S * E * 4
                      + (N // nb) * L * weight_bytes_per_layer)

    fn = pl.pallas_call(
        functools.partial(encoder_stack_kernel, num_heads=H),
        out_shape=jax.ShapeDtypeStruct((N, S, E), jnp.float32),
        grid_spec=pltpu.PrefetchScalarGridSpec(
            num_scalar_prefetch=0,
            grid=(N // nb, L),                 # layer axis minor => sequential
            in_specs=in_specs,
            out_specs=pl.BlockSpec((nb, S, E), lambda b, l: (b, 0, 0)),
            scratch_shapes=[pltpu.VMEM((nb, S, E), jnp.float32)],  # resident act
        ),
        compiler_params=pltpu.CompilerParams(
            dimension_semantics=("parallel", "arbitrary"),
            vmem_limit_bytes=int(vmem_limit),
        ),
        cost_estimate=pl.CostEstimate(
            flops=int(flops),
            transcendentals=int(transcendentals),
            bytes_accessed=int(bytes_accessed)),
    )
    out = fn(x, stacked["wqkv"], stacked["wo"], stacked["w1"], stacked["w2"],
             stacked["vec"])
    return jnp.transpose(out, (1, 0, 2))      # back to (S, N, E)


# --------------------------- pure-JAX reference ---------------------------- #
# Mirrors the kernel's bf16-operand / f32-accumulation matmul numerics.

def _ref_layer(x_nse, lp, num_heads):
    N, S, E = x_nse.shape
    H, Dh = num_heads, E // num_heads
    Mff = lp["w1"].shape[1]
    bf16 = jnp.bfloat16
    vec = lp["vec"]
    bqkv, b1 = vec[0, :3 * E], vec[1, :Mff]
    bo, b2 = vec[2, :E], vec[3, :E]
    g1, be1, g2, be2 = vec[4, :E], vec[5, :E], vec[6, :E], vec[7, :E]

    x2 = x_nse.reshape(N * S, E)
    qkv = jnp.dot(x2.astype(bf16), lp["wqkv"],
                  preferred_element_type=jnp.float32) + bqkv
    q = qkv[:, :E].reshape(N, S, H, Dh)
    k = qkv[:, E:2 * E].reshape(N, S, H, Dh)
    v = qkv[:, 2 * E:].reshape(N, S, H, Dh)
    s = jnp.einsum('nqhd,nkhd->nhqk', q.astype(bf16), k.astype(bf16),
                   preferred_element_type=jnp.float32) / math.sqrt(Dh)
    p = jax.nn.softmax(s, axis=-1)
    ctx = jnp.einsum('nhqk,nkhd->nqhd', p.astype(bf16), v.astype(bf16),
                     preferred_element_type=jnp.float32)
    attn = ctx.reshape(N * S, E)
    attn = jnp.dot(attn.astype(bf16), lp["wo"],
                   preferred_element_type=jnp.float32) + bo

    def ln(y, g, b):
        m = jnp.mean(y, -1, keepdims=True)
        var = jnp.mean((y - m) ** 2, -1, keepdims=True)
        return (y - m) / jnp.sqrt(var + 1e-5) * g + b

    h1 = ln(x2 + attn, g1, be1)
    ff = jnp.dot(h1.astype(bf16), lp["w1"],
                 preferred_element_type=jnp.float32) + b1
    ff = jnp.maximum(ff, 0.0)
    ff = jnp.dot(ff.astype(bf16), lp["w2"],
                 preferred_element_type=jnp.float32) + b2
    return ln(h1 + ff, g2, be2).reshape(N, S, E)


def _ref_encoder(x_sne, layer_params, num_heads):
    x = jnp.transpose(x_sne, (1, 0, 2))
    for lp in layer_params:
        x = _ref_layer(x, lp, num_heads)
    return jnp.transpose(x, (1, 0, 2))


# ------------------------------ param setup -------------------------------- #

def make_layer_params(key, emb, mlp):
    ks = jax.random.split(key, 10)
    sc = 0.05
    # torch layouts: Linear weight is (out, in); in_proj rows are [q; k; v]
    in_proj_w = jax.random.normal(ks[0], (3 * emb, emb), jnp.float32) * sc
    in_proj_b = jax.random.normal(ks[1], (3 * emb,), jnp.float32) * sc
    out_w = jax.random.normal(ks[2], (emb, emb), jnp.float32) * sc
    out_b = jax.random.normal(ks[3], (emb,), jnp.float32) * sc
    w1 = jax.random.normal(ks[4], (mlp, emb), jnp.float32) * sc
    b1 = jax.random.normal(ks[5], (mlp,), jnp.float32) * sc
    w2 = jax.random.normal(ks[6], (emb, mlp), jnp.float32) * sc
    b2 = jax.random.normal(ks[7], (emb,), jnp.float32) * sc
    g1 = 1.0 + 0.1 * jax.random.normal(ks[8], (emb,), jnp.float32)
    g2 = 1.0 + 0.1 * jax.random.normal(ks[9], (emb,), jnp.float32)
    be1 = jnp.zeros((emb,), jnp.float32)
    be2 = jnp.zeros((emb,), jnp.float32)

    wmax = max(3 * emb, mlp)
    vec = jnp.zeros((8, wmax), jnp.float32)
    vec = vec.at[0, :3 * emb].set(in_proj_b)
    vec = vec.at[1, :mlp].set(b1)
    vec = vec.at[2, :emb].set(out_b)
    vec = vec.at[3, :emb].set(b2)
    vec = vec.at[4, :emb].set(g1)
    vec = vec.at[5, :emb].set(be1)
    vec = vec.at[6, :emb].set(g2)
    vec = vec.at[7, :emb].set(be2)

    # pre-transpose torch (out,in) weights so the kernel does x @ W + b;
    # weights stored in bf16 (MXU operands), vector params stay f32.
    return {
        "wqkv": jnp.asarray(in_proj_w.T, jnp.bfloat16),   # (E, 3E), q|k|v cols
        "wo": jnp.asarray(out_w.T, jnp.bfloat16),         # (E, E)
        "w1": jnp.asarray(w1.T, jnp.bfloat16),            # (E, M)
        "w2": jnp.asarray(w2.T, jnp.bfloat16),            # (M, E)
        "vec": vec,                                       # (8, max(3E, M)) f32
    }


if __name__ == "__main__":
    # small, module-consistent shapes (scaled-down ViT encoder)
    SEQ, BATCH, EMB, HEADS, MLP, DEPTH = 8, 4, 128, 4, 256, 2

    key = jax.random.PRNGKey(0)
    kx, kp = jax.random.split(key)
    x = jax.random.normal(kx, (SEQ, BATCH, EMB), jnp.float32)   # (S, N, E)

    params = [make_layer_params(k, EMB, MLP) for k in jax.random.split(kp, DEPTH)]

    out = jax.block_until_ready(transformer_encoder_pallas(x, params, HEADS))
    ref = jax.block_until_ready(_ref_encoder(x, params, HEADS))

    np.testing.assert_allclose(np.asarray(out), np.asarray(ref),
                               rtol=1e-2, atol=1e-2)
    assert out.shape == (SEQ, BATCH, EMB)
    print("KERNEL_OK")
</pallas_src>

<mosaic_0001>
module attributes {stable_mosaic.version = 11 : i64} {
  func.func @encoder_stack_kernel(%arg0: i32, %arg1: i32, %arg2: memref<4x8x128xf32, #tpu.memory_space<vmem>>, %arg3: memref<1x128x384xbf16, #tpu.memory_space<vmem>>, %arg4: memref<1x128x128xbf16, #tpu.memory_space<vmem>>, %arg5: memref<1x128x256xbf16, #tpu.memory_space<vmem>>, %arg6: memref<1x256x128xbf16, #tpu.memory_space<vmem>>, %arg7: memref<1x8x384xf32, #tpu.memory_space<vmem>>, %arg8: memref<4x8x128xf32, #tpu.memory_space<vmem>>, %arg9: memref<4x8x128xf32, #tpu.memory_space<vmem>>) attributes {dimension_semantics = [#tpu.dimension_semantics<parallel>, #tpu.dimension_semantics<arbitrary>], iteration_bounds = array<i64: 1, 2>, scalar_prefetch = 0 : i64, scratch_operands = 1 : i64, tpu.core_type = #tpu.core_type<tc>, window_params = [{transform_indices = @transform_0, window_bounds = array<i64: 4, 8, 128>}, {transform_indices = @transform_1, window_bounds = array<i64: 1, 128, 384>}, {transform_indices = @transform_2, window_bounds = array<i64: 1, 128, 128>}, {transform_indices = @transform_3, window_bounds = array<i64: 1, 128, 256>}, {transform_indices = @transform_4, window_bounds = array<i64: 1, 256, 128>}, {transform_indices = @transform_5, window_bounds = array<i64: 1, 8, 384>}, {transform_indices = @transform_6, window_bounds = array<i64: 4, 8, 128>}]} {
    %c0_i32 = arith.constant 0 : i32
    %0 = arith.cmpi eq, %arg1, %c0_i32 : i32
    %1 = arith.extui %0 : i1 to i32
    %c0_i32_0 = arith.constant 0 : i32
    %2 = arith.cmpi ne, %1, %c0_i32_0 : i32
    scf.if %2 {
      %c0_55 = arith.constant 0 : index
      %c0_56 = arith.constant 0 : index
      %c0_57 = arith.constant 0 : index
      %143 = vector.load %arg2[%c0_55, %c0_56, %c0_57] : memref<4x8x128xf32, #tpu.memory_space<vmem>>, vector<4x8x128xf32>
      %c0_58 = arith.constant 0 : index
      %c0_59 = arith.constant 0 : index
      %c0_60 = arith.constant 0 : index
      %144 = vector.load %arg9[%c0_58, %c0_59, %c0_60] : memref<4x8x128xf32, #tpu.memory_space<vmem>>, vector<4x8x128xf32>
      tpu.vector_store %arg9[%c0_58, %c0_59, %c0_60], %143 {strides = array<i32>} : memref<4x8x128xf32, #tpu.memory_space<vmem>>, vector<4x8x128xf32>,
    } else {
    }
    %c0 = arith.constant 0 : index
    %c0_1 = arith.constant 0 : index
    %c0_2 = arith.constant 0 : index
    %3 = vector.load %arg7[%c0, %c0_1, %c0_2] : memref<1x8x384xf32, #tpu.memory_space<vmem>>, vector<1x1x384xf32>
    %4 = vector.shape_cast %3 : vector<1x1x384xf32> to vector<1x384xf32>
    %c0_3 = arith.constant 0 : index
    %c1 = arith.constant 1 : index
    %c0_4 = arith.constant 0 : index
    %5 = vector.load %arg7[%c0_3, %c1, %c0_4] : memref<1x8x384xf32, #tpu.memory_space<vmem>>, vector<1x1x256xf32>
    %6 = vector.shape_cast %5 : vector<1x1x256xf32> to vector<1x256xf32>
    %c0_5 = arith.constant 0 : index
    %c2 = arith.constant 2 : index
    %c0_6 = arith.constant 0 : index
    %7 = vector.load %arg7[%c0_5, %c2, %c0_6] : memref<1x8x384xf32, #tpu.memory_space<vmem>>, vector<1x1x128xf32>
    %8 = vector.shape_cast %7 : vector<1x1x128xf32> to vector<1x128xf32>
    %c0_7 = arith.constant 0 : index
    %c3 = arith.constant 3 : index
    %c0_8 = arith.constant 0 : index
    %9 = vector.load %arg7[%c0_7, %c3, %c0_8] : memref<1x8x384xf32, #tpu.memory_space<vmem>>, vector<1x1x128xf32>
    %10 = vector.shape_cast %9 : vector<1x1x128xf32> to vector<1x128xf32>
    %c0_9 = arith.constant 0 : index
    %c4 = arith.constant 4 : index
    %c0_10 = arith.constant 0 : index
    %11 = vector.load %arg7[%c0_9, %c4, %c0_10] : memref<1x8x384xf32, #tpu.memory_space<vmem>>, vector<1x1x128xf32>
    %12 = vector.shape_cast %11 : vector<1x1x128xf32> to vector<1x128xf32>
    %c0_11 = arith.constant 0 : index
    %c5 = arith.constant 5 : index
    %c0_12 = arith.constant 0 : index
    %13 = vector.load %arg7[%c0_11, %c5, %c0_12] : memref<1x8x384xf32, #tpu.memory_space<vmem>>, vector<1x1x128xf32>
    %14 = vector.shape_cast %13 : vector<1x1x128xf32> to vector<1x128xf32>
    %c0_13 = arith.constant 0 : index
    %c6 = arith.constant 6 : index
    %c0_14 = arith.constant 0 : index
    %15 = vector.load %arg7[%c0_13, %c6, %c0_14] : memref<1x8x384xf32, #tpu.memory_space<vmem>>, vector<1x1x128xf32>
    %16 = vector.shape_cast %15 : vector<1x1x128xf32> to vector<1x128xf32>
    %c0_15 = arith.constant 0 : index
    %c7 = arith.constant 7 : index
    %c0_16 = arith.constant 0 : index
    %17 = vector.load %arg7[%c0_15, %c7, %c0_16] : memref<1x8x384xf32, #tpu.memory_space<vmem>>, vector<1x1x128xf32>
    %18 = vector.shape_cast %17 : vector<1x1x128xf32> to vector<1x128xf32>
    %c0_17 = arith.constant 0 : index
    %c0_18 = arith.constant 0 : index
    %c0_19 = arith.constant 0 : index
    %19 = vector.load %arg9[%c0_17, %c0_18, %c0_19] : memref<4x8x128xf32, #tpu.memory_space<vmem>>, vector<4x8x128xf32>
    %20 = vector.shape_cast %19 : vector<4x8x128xf32> to vector<32x128xf32>
    %21 = arith.truncf %20 : vector<32x128xf32> to vector<32x128xbf16>
    %c0_20 = arith.constant 0 : index
    %c0_21 = arith.constant 0 : index
    %c0_22 = arith.constant 0 : index
    %22 = vector.load %arg3[%c0_20, %c0_21, %c0_22] : memref<1x128x384xbf16, #tpu.memory_space<vmem>>, vector<1x128x384xbf16>
    %23 = vector.shape_cast %22 : vector<1x128x384xbf16> to vector<128x384xbf16>
    %cst = arith.constant dense<0.000000e+00> : vector<32x384xf32>
    %24 = tpu.matmul %21, %23, %cst {dimension_numbers = #tpu.dot_dimension_numbers<[1], [0], [0], [1], [0, 0, 1, 1], [], []>} : vector<32x128xbf16>, vector<128x384xbf16>, vector<32x384xf32> -> vector<32x384xf32>
    %25 = vector.broadcast %4 : vector<1x384xf32> to vector<32x384xf32>
    %26 = arith.addf %24, %25 : vector<32x384xf32>
    %27 = vector.extract_strided_slice %26 {offsets = [0, 0], sizes = [32, 128], strides = [1, 1]} : vector<32x384xf32> to vector<32x128xf32>
    %28 = vector.shape_cast %27 : vector<32x128xf32> to vector<4x8x128xf32>
    %29 = vector.extract_strided_slice %26 {offsets = [0, 128], sizes = [32, 128], strides = [1, 1]} : vector<32x384xf32> to vector<32x128xf32>
    %30 = vector.shape_cast %29 : vector<32x128xf32> to vector<4x8x128xf32>
    %31 = vector.extract_strided_slice %26 {offsets = [0, 256], sizes = [32, 128], strides = [1, 1]} : vector<32x384xf32> to vector<32x128xf32>
    %32 = vector.shape_cast %31 : vector<32x128xf32> to vector<4x8x128xf32>
    %33 = vector.extract_strided_slice %28 {offsets = [0, 0, 0], sizes = [4, 8, 32], strides = [1, 1, 1]} : vector<4x8x128xf32> to vector<4x8x32xf32>
    %34 = vector.extract_strided_slice %28 {offsets = [0, 0, 32], sizes = [4, 8, 32], strides = [1, 1, 1]} : vector<4x8x128xf32> to vector<4x8x32xf32>
    %35 = vector.extract_strided_slice %28 {offsets = [0, 0, 64], sizes = [4, 8, 32], strides = [1, 1, 1]} : vector<4x8x128xf32> to vector<4x8x32xf32>
    %36 = vector.extract_strided_slice %28 {offsets = [0, 0, 96], sizes = [4, 8, 32], strides = [1, 1, 1]} : vector<4x8x128xf32> to vector<4x8x32xf32>
    %37 = tpu.concatenate %33, %34, %35, %36 in 0 : vector<4x8x32xf32>, vector<4x8x32xf32>, vector<4x8x32xf32>, vector<4x8x32xf32> -> vector<16x8x32xf32>
    %38 = arith.truncf %37 : vector<16x8x32xf32> to vector<16x8x32xbf16>
    %39 = vector.extract_strided_slice %30 {offsets = [0, 0, 0], sizes = [4, 8, 32], strides = [1, 1, 1]} : vector<4x8x128xf32> to vector<4x8x32xf32>
    %40 = vector.extract_strided_slice %30 {offsets = [0, 0, 32], sizes = [4, 8, 32], strides = [1, 1, 1]} : vector<4x8x128xf32> to vector<4x8x32xf32>
    %41 = vector.extract_strided_slice %30 {offsets = [0, 0, 64], sizes = [4, 8, 32], strides = [1, 1, 1]} : vector<4x8x128xf32> to vector<4x8x32xf32>
    %42 = vector.extract_strided_slice %30 {offsets = [0, 0, 96], sizes = [4, 8, 32], strides = [1, 1, 1]} : vector<4x8x128xf32> to vector<4x8x32xf32>
    %43 = tpu.concatenate %39, %40, %41, %42 in 0 : vector<4x8x32xf32>, vector<4x8x32xf32>, vector<4x8x32xf32>, vector<4x8x32xf32> -> vector<16x8x32xf32>
    %44 = arith.truncf %43 : vector<16x8x32xf32> to vector<16x8x32xbf16>
    %45 = vector.extract_strided_slice %32 {offsets = [0, 0, 0], sizes = [4, 8, 32], strides = [1, 1, 1]} : vector<4x8x128xf32> to vector<4x8x32xf32>
    %46 = vector.extract_strided_slice %32 {offsets = [0, 0, 32], sizes = [4, 8, 32], strides = [1, 1, 1]} : vector<4x8x128xf32> to vector<4x8x32xf32>
    %47 = vector.extract_strided_slice %32 {offsets = [0, 0, 64], sizes = [4, 8, 32], strides = [1, 1, 1]} : vector<4x8x128xf32> to vector<4x8x32xf32>
    %48 = vector.extract_strided_slice %32 {offsets = [0, 0, 96], sizes = [4, 8, 32], strides = [1, 1, 1]} : vector<4x8x128xf32> to vector<4x8x32xf32>
    %49 = tpu.concatenate %45, %46, %47, %48 in 0 : vector<4x8x32xf32>, vector<4x8x32xf32>, vector<4x8x32xf32>, vector<4x8x32xf32> -> vector<16x8x32xf32>
    %50 = arith.truncf %49 : vector<16x8x32xf32> to vector<16x8x32xbf16>
    "tpu.trace_start"() <{level = 10 : i32, message = "bqd,bkd->bqk"}> : () -> ()
    %cst_23 = arith.constant dense<0.000000e+00> : vector<16x8x8xf32>
    %51 = tpu.matmul %38, %44, %cst_23 {dimension_numbers = #tpu.dot_dimension_numbers<[2], [2], [1], [1], [0, 0, 0, 1, 1, 1], [0], [0]>} : vector<16x8x32xbf16>, vector<16x8x32xbf16>, vector<16x8x8xf32> -> vector<16x8x8xf32>
    "tpu.trace_stop"() : () -> ()
    %cst_24 = arith.constant 0.176776692 : f32
    %52 = vector.broadcast %cst_24 : f32 to vector<16x8x8xf32>
    %53 = arith.mulf %51, %52 : vector<16x8x8xf32>
    %cst_25 = arith.constant dense<0xFF800000> : vector<16x8xf32>
    %54 = vector.multi_reduction <maximumf>, %53, %cst_25 [2] : vector<16x8x8xf32> to vector<16x8xf32>
    %55 = vector.shape_cast %54 : vector<16x8xf32> to vector<16x8x1xf32>
    %56 = vector.broadcast %55 : vector<16x8x1xf32> to vector<16x8x8xf32>
    %57 = arith.subf %53, %56 : vector<16x8x8xf32>
    %58 = math.exp %57 : vector<16x8x8xf32>
    %cst_26 = arith.constant dense<0.000000e+00> : vector<16x8xf32>
    %59 = vector.multi_reduction <add>, %58, %cst_26 [2] : vector<16x8x8xf32> to vector<16x8xf32>
    %60 = vector.shape_cast %59 : vector<16x8xf32> to vector<16x8x1xf32>
    %61 = tpu.reciprocal %60 {approx = true} : vector<16x8x1xf32> -> vector<16x8x1xf32>
    %62 = vector.broadcast %61 : vector<16x8x1xf32> to vector<16x8x8xf32>
    %63 = arith.mulf %58, %62 : vector<16x8x8xf32>
    %64 = arith.truncf %63 : vector<16x8x8xf32> to vector<16x8x8xbf16>
    "tpu.trace_start"() <{level = 10 : i32, message = "bqk,bkd->bqd"}> : () -> ()
    %cst_27 = arith.constant dense<0.000000e+00> : vector<16x8x32xf32>
    %65 = tpu.matmul %64, %50, %cst_27 {dimension_numbers = #tpu.dot_dimension_numbers<[2], [1], [1], [2], [0, 0, 0, 1, 1, 2], [0], [0]>} : vector<16x8x8xbf16>, vector<16x8x32xbf16>, vector<16x8x32xf32> -> vector<16x8x32xf32>
    "tpu.trace_stop"() : () -> ()
    %66 = vector.extract_strided_slice %65 {offsets = [0, 0, 0], sizes = [4, 8, 32], strides = [1, 1, 1]} : vector<16x8x32xf32> to vector<4x8x32xf32>
    %67 = vector.extract_strided_slice %65 {offsets = [4, 0, 0], sizes = [4, 8, 32], strides = [1, 1, 1]} : vector<16x8x32xf32> to vector<4x8x32xf32>
    %68 = vector.extract_strided_slice %65 {offsets = [8, 0, 0], sizes = [4, 8, 32], strides = [1, 1, 1]} : vector<16x8x32xf32> to vector<4x8x32xf32>
    %69 = vector.extract_strided_slice %65 {offsets = [12, 0, 0], sizes = [4, 8, 32], strides = [1, 1, 1]} : vector<16x8x32xf32> to vector<4x8x32xf32>
    %70 = tpu.concatenate %66, %67, %68, %69 in 2 : vector<4x8x32xf32>, vector<4x8x32xf32>, vector<4x8x32xf32>, vector<4x8x32xf32> -> vector<4x8x128xf32>
    %71 = vector.shape_cast %70 : vector<4x8x128xf32> to vector<32x128xf32>
    %72 = arith.truncf %71 : vector<32x128xf32> to vector<32x128xbf16>
    %c0_28 = arith.constant 0 : index
    %c0_29 = arith.constant 0 : index
    %c0_30 = arith.constant 0 : index
    %73 = vector.load %arg4[%c0_28, %c0_29, %c0_30] : memref<1x128x128xbf16, #tpu.memory_space<vmem>>, vector<1x128x128xbf16>
    %74 = vector.shape_cast %73 : vector<1x128x128xbf16> to vector<128x128xbf16>
    %cst_31 = arith.constant dense<0.000000e+00> : vector<32x128xf32>
    %75 = tpu.matmul %72, %74, %cst_31 {dimension_numbers = #tpu.dot_dimension_numbers<[1], [0], [0], [1], [0, 0, 1, 1], [], []>} : vector<32x128xbf16>, vector<128x128xbf16>, vector<32x128xf32> -> vector<32x128xf32>
    %76 = vector.broadcast %8 : vector<1x128xf32> to vector<32x128xf32>
    %77 = arith.addf %75, %76 : vector<32x128xf32>
    %78 = arith.addf %20, %77 : vector<32x128xf32>
    %cst_32 = arith.constant dense<0.000000e+00> : vector<32xf32>
    %79 = vector.multi_reduction <add>, %78, %cst_32 [1] : vector<32x128xf32> to vector<32xf32>
    %80 = vector.shape_cast %79 : vector<32xf32> to vector<32x1xf32>
    %cst_33 = arith.constant 1.280000e+02 : f32
    %81 = vector.broadcast %cst_33 : f32 to vector<32x1xf32>
    %82 = arith.divf %80, %81 : vector<32x1xf32>
    %83 = vector.broadcast %82 : vector<32x1xf32> to vector<32x128xf32>
    %84 = arith.subf %78, %83 : vector<32x128xf32>
    %85 = arith.mulf %84, %84 : vector<32x128xf32>
    %cst_34 = arith.constant dense<0.000000e+00> : vector<32xf32>
    %86 = vector.multi_reduction <add>, %85, %cst_34 [1] : vector<32x128xf32> to vector<32xf32>
    %87 = vector.shape_cast %86 : vector<32xf32> to vector<32x1xf32>
    %cst_35 = arith.constant 1.280000e+02 : f32
    %88 = vector.broadcast %cst_35 : f32 to vector<32x1xf32>
    %89 = arith.divf %87, %88 : vector<32x1xf32>
    %90 = vector.broadcast %82 : vector<32x1xf32> to vector<32x128xf32>
    %91 = arith.subf %78, %90 : vector<32x128xf32>
    %cst_36 = arith.constant 9.99999974E-6 : f32
    %92 = vector.broadcast %cst_36 : f32 to vector<32x1xf32>
    %93 = arith.addf %89, %92 : vector<32x1xf32>
    %94 = math.rsqrt %93 : vector<32x1xf32>
    %95 = vector.broadcast %94 : vector<32x1xf32> to vector<32x128xf32>
    %96 = arith.mulf %91, %95 : vector<32x128xf32>
    %97 = vector.broadcast %12 : vector<1x128xf32> to vector<32x128xf32>
    %98 = arith.mulf %96, %97 : vector<32x128xf32>
    %99 = vector.broadcast %14 : vector<1x128xf32> to vector<32x128xf32>
    %100 = arith.addf %98, %99 : vector<32x128xf32>
    %101 = arith.truncf %100 : vector<32x128xf32> to vector<32x128xbf16>
    %c0_37 = arith.constant 0 : index
    %c0_38 = arith.constant 0 : index
    %c0_39 = arith.constant 0 : index
    %102 = vector.load %arg5[%c0_37, %c0_38, %c0_39] : memref<1x128x256xbf16, #tpu.memory_space<vmem>>, vector<1x128x256xbf16>
    %103 = vector.shape_cast %102 : vector<1x128x256xbf16> to vector<128x256xbf16>
    %cst_40 = arith.constant dense<0.000000e+00> : vector<32x256xf32>
    %104 = tpu.matmul %101, %103, %cst_40 {dimension_numbers = #tpu.dot_dimension_numbers<[1], [0], [0], [1], [0, 0, 1, 1], [], []>} : vector<32x128xbf16>, vector<128x256xbf16>, vector<32x256xf32> -> vector<32x256xf32>
    %105 = vector.broadcast %6 : vector<1x256xf32> to vector<32x256xf32>
    %106 = arith.addf %104, %105 : vector<32x256xf32>
    %cst_41 = arith.constant 0.000000e+00 : f32
    %107 = vector.broadcast %cst_41 : f32 to vector<32x256xf32>
    %108 = arith.maximumf %106, %107 : vector<32x256xf32>
    %109 = arith.truncf %108 : vector<32x256xf32> to vector<32x256xbf16>
    %c0_42 = arith.constant 0 : index
    %c0_43 = arith.constant 0 : index
    %c0_44 = arith.constant 0 : index
    %110 = vector.load %arg6[%c0_42, %c0_43, %c0_44] : memref<1x256x128xbf16, #tpu.memory_space<vmem>>, vector<1x256x128xbf16>
    %111 = vector.shape_cast %110 : vector<1x256x128xbf16> to vector<256x128xbf16>
    %cst_45 = arith.constant dense<0.000000e+00> : vector<32x128xf32>
    %112 = tpu.matmul %109, %111, %cst_45 {dimension_numbers = #tpu.dot_dimension_numbers<[1], [0], [0], [1], [0, 0, 1, 1], [], []>} : vector<32x256xbf16>, vector<256x128xbf16>, vector<32x128xf32> -> vector<32x128xf32>
    %113 = vector.broadcast %10 : vector<1x128xf32> to vector<32x128xf32>
    %114 = arith.addf %112, %113 : vector<32x128xf32>
    %115 = arith.addf %100, %114 : vector<32x128xf32>
    %cst_46 = arith.constant dense<0.000000e+00> : vector<32xf32>
    %116 = vector.multi_reduction <add>, %115, %cst_46 [1] : vector<32x128xf32> to vector<32xf32>
    %117 = vector.shape_cast %116 : vector<32xf32> to vector<32x1xf32>
    %cst_47 = arith.constant 1.280000e+02 : f32
    %118 = vector.broadcast %cst_47 : f32 to vector<32x1xf32>
    %119 = arith.divf %117, %118 : vector<32x1xf32>
    %120 = vector.broadcast %119 : vector<32x1xf32> to vector<32x128xf32>
    %121 = arith.subf %115, %120 : vector<32x128xf32>
    %122 = arith.mulf %121, %121 : vector<32x128xf32>
    %cst_48 = arith.constant dense<0.000000e+00> : vector<32xf32>
    %123 = vector.multi_reduction <add>, %122, %cst_48 [1] : vector<32x128xf32> to vector<32xf32>
    %124 = vector.shape_cast %123 : vector<32xf32> to vector<32x1xf32>
    %cst_49 = arith.constant 1.280000e+02 : f32
    %125 = vector.broadcast %cst_49 : f32 to vector<32x1xf32>
    %126 = arith.divf %124, %125 : vector<32x1xf32>
    %127 = vector.broadcast %119 : vector<32x1xf32> to vector<32x128xf32>
    %128 = arith.subf %115, %127 : vector<32x128xf32>
    %cst_50 = arith.constant 9.99999974E-6 : f32
    %129 = vector.broadcast %cst_50 : f32 to vector<32x1xf32>
    %130 = arith.addf %126, %129 : vector<32x1xf32>
    %131 = math.rsqrt %130 : vector<32x1xf32>
    %132 = vector.broadcast %131 : vector<32x1xf32> to vector<32x128xf32>
    %133 = arith.mulf %128, %132 : vector<32x128xf32>
    %134 = vector.broadcast %16 : vector<1x128xf32> to vector<32x128xf32>
    %135 = arith.mulf %133, %134 : vector<32x128xf32>
    %136 = vector.broadcast %18 : vector<1x128xf32> to vector<32x128xf32>
    %137 = arith.addf %135, %136 : vector<32x128xf32>
    %138 = vector.shape_cast %137 : vector<32x128xf32> to vector<4x8x128xf32>
    %c0_51 = arith.constant 0 : index
    %c0_52 = arith.constant 0 : index
    %c0_53 = arith.constant 0 : index
    %139 = vector.load %arg9[%c0_51, %c0_52, %c0_53] : memref<4x8x128xf32, #tpu.memory_space<vmem>>, vector<4x8x128xf32>
    tpu.vector_store %arg9[%c0_51, %c0_52, %c0_53], %138 {strides = array<i32>} : memref<4x8x128xf32, #tpu.memory_space<vmem>>, vector<4x8x128xf32>,
    %c1_i32 = arith.constant 1 : i32
    %140 = arith.cmpi eq, %arg1, %c1_i32 : i32
    %141 = arith.extui %140 : i1 to i32
    %c0_i32_54 = arith.constant 0 : i32
    %142 = arith.cmpi ne, %141, %c0_i32_54 : i32
    scf.if %142 {
      %c0_55 = arith.constant 0 : index
      %c0_56 = arith.constant 0 : index
      %c0_57 = arith.constant 0 : index
      %143 = vector.load %arg8[%c0_55, %c0_56, %c0_57] : memref<4x8x128xf32, #tpu.memory_space<vmem>>, vector<4x8x128xf32>
      tpu.vector_store %arg8[%c0_55, %c0_56, %c0_57], %138 {strides = array<i32>} : memref<4x8x128xf32, #tpu.memory_space<vmem>>, vector<4x8x128xf32>,
    } else {
    }
    return
  }
  func.func @transform_0(%arg0: i32, %arg1: i32) -> (i32, i32, i32) {
    %c0_i32 = arith.constant 0 : i32
    %c0_i32_0 = arith.constant 0 : i32
    %c0_i32_1 = arith.constant 0 : i32
    return %arg0, %c0_i32, %c0_i32_0 : i32, i32, i32
  }
  func.func @transform_1(%arg0: i32, %arg1: i32) -> (i32, i32, i32) {
    %c0_i32 = arith.constant 0 : i32
    %c0_i32_0 = arith.constant 0 : i32
    %c0_i32_1 = arith.constant 0 : i32
    return %arg1, %c0_i32, %c0_i32_0 : i32, i32, i32
  }
  func.func @transform_2(%arg0: i32, %arg1: i32) -> (i32, i32, i32) {
    %c0_i32 = arith.constant 0 : i32
    %c0_i32_0 = arith.constant 0 : i32
    %c0_i32_1 = arith.constant 0 : i32
    return %arg1, %c0_i32, %c0_i32_0 : i32, i32, i32
  }
  func.func @transform_3(%arg0: i32, %arg1: i32) -> (i32, i32, i32) {
    %c0_i32 = arith.constant 0 : i32
    %c0_i32_0 = arith.constant 0 : i32
    %c0_i32_1 = arith.constant 0 : i32
    return %arg1, %c0_i32, %c0_i32_0 : i32, i32, i32
  }
  func.func @transform_4(%arg0: i32, %arg1: i32) -> (i32, i32, i32) {
    %c0_i32 = arith.constant 0 : i32
    %c0_i32_0 = arith.constant 0 : i32
    %c0_i32_1 = arith.constant 0 : i32
    return %arg1, %c0_i32, %c0_i32_0 : i32, i32, i32
  }
  func.func @transform_5(%arg0: i32, %arg1: i32) -> (i32, i32, i32) {
    %c0_i32 = arith.constant 0 : i32
    %c0_i32_0 = arith.constant 0 : i32
    %c0_i32_1 = arith.constant 0 : i32
    return %arg1, %c0_i32, %c0_i32_0 : i32, i32, i32
  }
  func.func @transform_6(%arg0: i32, %arg1: i32) -> (i32, i32, i32) {
    %c0_i32 = arith.constant 0 : i32
    %c0_i32_0 = arith.constant 0 : i32
    %c0_i32_1 = arith.constant 0 : i32
    return %arg0, %c0_i32, %c0_i32_0 : i32, i32, i32
  }
}

</mosaic_0001>

<bundles_post_ra>
// kernel: tpu_custom_call.1
= control target key start
LH: loop header
LB: loop body
LE: loop exit
PB: predicated region body
PF: predicated region fallthrough
CT: control target
= control target key end

     0   :  { %s4249_s0 = inlined_call_operand.hbm [shape: f32[4,8,128], index: 0, kind: input, shape index: {}]   ;;  %s4250_s1 = inlined_call_operand.hbm [shape: bf16[2,128,384], index: 1, kind: input, shape index: {}]   ;;  %s4251_s2 = inlined_call_operand.hbm [shape: bf16[2,128,128], index: 2, kind: input, shape index: {}]   ;;  %s4252_s3 = inlined_call_operand.hbm [shape: bf16[2,128,256], index: 3, kind: input, shape index: {}]   ;;  %s4253_s4 = inlined_call_operand.hbm [shape: bf16[2,256,128], index: 4, kind: input, shape index: {}]   ;;  %s4254_s5 = inlined_call_operand.hbm [shape: f32[2,8,384], index: 5, kind: input, shape index: {}]   ;;  %s4255_s6 = inlined_call_operand.hbm [shape: f32[4,8,128], index: 6, kind: output, shape index: {}]  }
   0x1   :  { %4260 = sst [smem:[#allocation23_spill]] %s4249_s0 }
   0x2   :  { %4261 = sst [smem:[#allocation24_spill]] %s4250_s1 }
   0x3   :  { %4262 = sst [smem:[#allocation25_spill]] %s4251_s2 }
   0x4   :  { %4263 = sst [smem:[#allocation26_spill]] %s4252_s3 }
   0x5   :  { %4264 = sst [smem:[#allocation27_spill]] %s4253_s4 }
   0x6   :  { %11 = vsyncpa [#allocation4], 0 }
   0x7   :  { %12 = vsyncpa [#allocation7], 0 }
   0x8   :  { %14 = vsyncpa [#allocation7 + $0x1], 0 }
   0x9   :  { %15 = vsyncpa [#allocation10], 0 }
   0xa   :  { %17 = vsyncpa [#allocation10 + $0x1], 0 }
   0xb   :  { %18 = vsyncpa [#allocation13], 0 }
   0xc   :  { %20 = vsyncpa [#allocation13 + $0x1], 0 }
   0xd   :  { %21 = vsyncpa [#allocation5], 0  ;;  %s3571_s21 = smov 0   ;;  %s3573_s22 = smov 0  }
   0xe   :  { %s3575_s23 = smov 0   ;;  %s3577_s24 = smov 0  }
   0xf   :  { %s3579_s25 = smov 0   ;;  %s3581_s26 = smov 0  }
  0x10 LB: > { %4265 = sst [smem:[#allocation20_spill]] %s3508_s23  ;;  %s36_s27 = sadd.s32 1, %s3516_s25  ;;  %s3520_s26 = sphi %s3581_s26, %s27_s26   ;;  %s3516_s25 = sphi %s3579_s25, %s4284_s25   ;;  %s3512_s24 = sphi %s3577_s24, %s4283_s24   ;;  %s3508_s23 = sphi %s3575_s23, %s4279_s23   ;;  %s3504_s22 = sphi %s3573_s22, %s4282_s22   ;;  %s3500_s21 = sphi %s3571_s21, %s4281_s21  }
  0x11   : > { %s72_s28 = sadd.s32 1, %s3508_s23  ;;  %p37_p0 = scmp.ge.s32.totalorder %s36_s27, 2 }
  0x12   : > { %p79_p1 = scmp.ne.s32.totalorder %s3508_s23, %s3504_s22  ;;  %p80_p2 = scmp.eq.s32.totalorder %s3520_s26, 0 }
  0x13   : > { %s4286_s27 = smov (%p37_p0, %s36_s27), 0  ;;  %p2974_p4 = scmp.lt.s32.totalorder %s3520_s26, 2 }
  0x14   : > { %4266 = sst [smem:[#allocation21_spill]] %s4286_s27  ;;  %p81_p3 = por %p80_p2, %p79_p1 }
  0x15   : > { %s69_s29 = ssub.s32 %s3516_s25, %s4286_s27  ;;  %s256_s30 = sand.u32 1, %s3520_s26  }
  0x16   : > { %p70_p5 = scmp.eq.s32.totalorder %s69_s29, 0  ;;  %s3613_s7 = sand.u32 1, %s3508_s23  }
  0x17   : > { %s2930_s8 = smul.u32 192, %s3516_s25  ;;  %s4268_s1 = sld [smem:[#allocation24_spill]] }
  0x18   : > { %s3617_s9 = scalar_select %p70_p5, %s3508_s23, %s72_s28  }
  0x19   : > { %s2929_s10 = smul.u32 192, %s3613_s7  ;;  %p3623_p6 = pnand %p2974_p4, %p81_p3 }
  0x1a   : > { %4267 = sst [smem:[#allocation22_spill]] %s3617_s9  ;;  %s3627_s18 = scalar_lea.sflag [#allocation7], %s256_s30 }
  0x1b   : > { %s260_s16 = scalar_lea.vmem [#allocation6], %s2929_s10  ;;  %s3522_s19 = smov 192  }
  0x1c   : > { %s268_s17 = sshll.u32 %s260_s16, 4  ;;  %s3523_s20 = smov 12   ;;  %s269_s17 = int_to_ptr.vmem [resolvable:$true] %s268_s17 }
  0x1d   : > { %s265_s13 = scalar_lea.hbm %s4268_s1, %s2930_s8  ;;  %s2555_s28 = sshll.u32 %s3613_s7, 7 }
  0x1e   : > { %s266_s14 = sshll.u32 %s265_s13, 4  ;;  %s2863_s29 = sshll.u32 %s3516_s25, 7  ;;  %s267_s14 = int_to_ptr.hbm [resolvable:$true] %s266_s14 }
  0x1f   : > { %2960 = dma.hbm_to_vmem [thread:$0]  (!%p3623_p6), %s267_s14, 3072, %s269_s17, %s3627_s18, %s3522_s19, %s3522_s19, %s3523_s20  }
  0x20   : > { %s4270_s3 = sld [smem:[#allocation26_spill]]  ;;  %s304_s10 = scalar_lea.vmem [#allocation9], %s2555_s28 }
  0x21   : > { %s312_s16 = sshll.u32 %s304_s10, 4  ;;  %s3637_s1 = scalar_lea.sflag [#allocation10], %s256_s30  ;;  %s313_s16 = int_to_ptr.vmem [resolvable:$true] %s312_s16 }
  0x22   : > { %s4256_s14 = smov 128   ;;  %s4257_s17 = smov 8  }
  0x23   : > { %s4271_s4 = sld [smem:[#allocation27_spill]]  ;;  %s3653_s30 = sadd.s32 4294967295, %s3520_s26  }
  0x24   : > { %p85_p7 = scmp.ne.s32.totalorder %s3504_s22, %s3500_s21  ;;  %p86_p8 = scmp.eq.s32.totalorder %s3653_s30, 0 }
  0x25   : > { %p2548_p9 = scmp.ge.s32.totalorder %s3520_s26, 1  ;;  %p226_p10 = scmp.lt.s32.totalorder %s3520_s26, 3 }
  0x26   : > { %s309_s12 = scalar_lea.hbm %s4270_s3, %s2863_s29  ;;  %p3662_p11 = por %p86_p8, %p85_p7 }
  0x27   : > { %s310_s13 = sshll.u32 %s309_s12, 4  ;;  %s326_s12 = scalar_lea.vmem [#allocation11], %s2555_s28  ;;  %s311_s13 = int_to_ptr.hbm [resolvable:$true] %s310_s13 }
  0x28   : > { %2966 = dma.hbm_to_vmem [thread:$0]  (!%p3623_p6), %s311_s13, 2048, %s313_s16, %s3637_s1, %s4256_s14, %s4256_s14, %s4257_s17  }
  0x29   : > { %s331_s8 = scalar_lea.hbm %s4271_s4, %s2863_s29  ;;  %s334_s10 = sshll.u32 %s326_s12, 4  ;;  %s3650_s10 = int_to_ptr.vmem [resolvable:$true] %s334_s10 }
  0x2a   : > { %s332_s11 = sshll.u32 %s331_s8, 4  ;;  %s4273_s0 = sld [smem:[#allocation23_spill]]  ;;  %s3648_s11 = int_to_ptr.hbm [resolvable:$true] %s332_s11 }
  0x2b   : > { %p3669_p12 = pnand %p2548_p9, %p226_p10  ;;  %s2552_s20 = sshll.u32 %s3613_s7, 6 }
  0x2c   : > { %s3526_s21 = smov [#allocation3]   ;;  %s2862_s12 = sshll.u32 %s3516_s25, 6 }
  0x2d   : > { %p2953_p13 = pneg %p3669_p12  ;;  %s242_s8 = sshll.u32 %s3526_s21, 4  ;;  %s243_s8 = int_to_ptr.vmem [resolvable:$true] %s242_s8 }
  0x2e   : > { %s4275_s2 = sld [smem:[#allocation25_spill]]  ;;  %s282_s17 = scalar_lea.vmem [#allocation8], %s2552_s20 }
  0x2f   : > { %p2954_p0 = pnand %p2953_p13, %p86_p8  ;;  %s4276_s4 = smov 8  }
  0x30   : > { %s240_s16 = sshll.u32 %s4273_s0, 4  ;;  %s290_s0 = sshll.u32 %s282_s17, 4  ;;  %s241_s16 = int_to_ptr.hbm [resolvable:$true] %s240_s16  ;;  %s291_s0 = int_to_ptr.vmem [resolvable:$true] %s290_s0 }
  0x31   : > { %s4277_s27 = smov 128   ;;  %s3527_s21 = smov 64  }
  0x32   : > { %2956 = dma.hbm_to_vmem [thread:$0]  (!%p2954_p0), %s241_s16, 512, %s243_s8, [#allocation4], %s4277_s27, %s4277_s27, %s4276_s4  }
  0x33   : > { %s3528_s9 = smov 4   ;;  %s2931_s23 = smul.u32 24, %s3613_s7 }
  0x34   : > { %s287_s14 = scalar_lea.hbm %s4275_s2, %s2862_s12  ;;  %s2932_s28 = smul.u32 24, %s3516_s25 }
  0x35   : > { %s288_s3 = sshll.u32 %s287_s14, 4  ;;  %s348_s17 = scalar_lea.vmem [#allocation12], %s2931_s23  ;;  %s289_s3 = int_to_ptr.hbm [resolvable:$true] %s288_s3 }
  0x36   : > { %2963 = dma.hbm_to_vmem [thread:$0]  (!%p3623_p6), %s289_s3, 1024, %s291_s0, %s3627_s18, %s3527_s21, %s3527_s21, %s3528_s9  }
  0x37   : > { %2969 = dma.hbm_to_vmem [thread:$0]  (!%p3623_p6), %s3648_s11, 2048, %s3650_s10, %s3637_s1, %s3527_s21, %s3527_s21, %s3528_s9  }
  0x38   : > { %s353_s14 = scalar_lea.hbm %s4254_s5, %s2932_s28  ;;  %s357_s13 = sshll.u32 %s348_s17, 4  ;;  %s358_s13 = int_to_ptr.vmem [resolvable:$true] %s357_s13 }
  0x39   : > { %s355_s2 = sshll.u32 %s353_s14, 4  ;;  %s345_s4 = scalar_lea.sflag [#allocation13], %s3613_s7  ;;  %s356_s2 = int_to_ptr.hbm [resolvable:$true] %s355_s2 }
  0x3a   : > { %2972 = dma.hbm_to_vmem [thread:$0]  (!%p3623_p6), %s356_s2, 384, %s358_s13, %s345_s4  }
  0x3b   : > { %366 = sbr.rel (%p3669_p12) target bundleno = 2117 (0x845), region = 44 }
  0x40   : > { %3479 = dma.done.wait (%p86_p8), [#allocation4], 512  }
  0x41   : > { %3481 = vsyncadd (%p86_p8), [#allocation4], 4294966784  ;;  %s373_s0 = sand.u32 1, %s3653_s30   ;;  %s375_s1 = sand.u32 1, %s3504_s22  }
  0x42   : > { %s2933_s3 = smul.u32 192, %s375_s1  ;;  %s374_s23 = scalar_lea.sflag [#allocation7], %s373_s0 }
  0x44   : > { %s3709_s27 = scalar_lea.vmem [#allocation6], %s2933_s3 }
  0x45   : > { %3483 = dma.done.wait (%p3662_p11), %s374_s23, 4096  }
  0x46   : > { %3485 = vsyncadd (%p3662_p11), %s374_s23, 4294963200  ;;  %s2564_s2 = sshll.u32 %s375_s1, 6  ;;  %s2565_s7 = sshll.u32 %s375_s1, 7 }
  0x47   : > { %s3715_s9 = scalar_lea.vmem [#allocation8], %s2564_s2  ;;  %s394_s15 = scalar_lea.sflag [#allocation10], %s373_s0 }
  0x48   : > { %s3717_s18 = scalar_lea.vmem [#allocation9], %s2565_s7 }
  0x49   : > { %3487 = dma.done.wait (%p3662_p11), %s394_s15, 4096  }
  0x4a   : > { %3489 = vsyncadd (%p3662_p11), %s394_s15, 4294963200  ;;  %s2934_s11 = smul.u32 24, %s375_s1  ;;  %s3723_s10 = scalar_lea.vmem [#allocation11], %s2565_s7 }
  0x4b   : > { %s414_s16 = scalar_lea.sflag [#allocation13], %s375_s1 }
  0x4c   : > { %s3725_s19 = scalar_lea.vmem [#allocation12], %s2934_s11 }
  0x4d   : > { %3491 = dma.done.wait (%p3662_p11), %s414_s16, 384  }
  0x4e   : > { %3493 = vsyncadd (%p3662_p11), %s414_s16, 4294966912  ;;  %p2567_p1 = scmp.ne.s32.totalorder %s3512_s24, 0 }
  0x50   : > { %468 = sbr.rel (%p2567_p1) target bundleno = 90 (0x5a), region = 72 }
  0x55   : > { %v469_v0 = vld [vmem:[#allocation3] sm:$0xff]  ;;  %v470_v1 = vld [vmem:[#allocation3 + $0x8] sm:$0xff]  ;;  %v471_v2 = vld [vmem:[#allocation3 + $0x10] sm:$0xff] }
  0x56   : > { %473 = vst [vmem:[#allocation2 + $0x10] sm:$0xff] %v469_v0  ;;  %v472_v3 = vld [vmem:[#allocation3 + $0x18] sm:$0xff] }
  0x57   : > { %474 = vst [vmem:[#allocation2] sm:$0xff] %v470_v1 }
  0x58   : > { %475 = vst [vmem:[#allocation2 + $0x18] sm:$0xff] %v471_v2 }
  0x59   : > { %476 = vst [vmem:[#allocation2 + $0x8] sm:$0xff] %v472_v3 }
  0x5a PF: > { %v2655_v4 = vld [vmem:[%s3709_s27 + $0xa8] sm:$0xf]  ;;  %v2887_v5 = vld [vmem:[%s3709_s27 + $0xb0] sm:$0xf0]  ;;  %v2886_v6 = vld [vmem:[%s3709_s27 + $0xac] sm:$0xf] }
  0x5b   : > { %v2656_v7 = vor.u32 %v2887_v5, %v2655_v4  ;;  %v2657_v8 = vld [vmem:[%s3709_s27 + $0xb4] sm:$0xf0]  ;;  %v2643_v9 = vld [vmem:[%s3709_s27 + $0x90] sm:$0xf]  ;;  %v2884_v10 = vld [vmem:[%s3709_s27 + $0x98] sm:$0xf0] }
  0x5c   : > { %v2660_v11 = vor.u32 %v2886_v6, %v2657_v8  ;;  %v2883_v12 = vld [vmem:[%s3709_s27 + $0x94] sm:$0xf]  ;;  %v2645_v13 = vld [vmem:[%s3709_s27 + $0x9c] sm:$0xf0]  ;;  %v2644_v14 = vor.u32 %v2884_v10, %v2643_v9  ;;  %v2631_v16 = vld [vmem:[%s3709_s27 + $0x78] sm:$0xf] }
  0x5d   : > { %659 = vmatpush.bf16.msra.mxu0 %v2656_v7  ;;  %v2648_v15 = vor.u32 %v2883_v12, %v2645_v13  ;;  %v2881_v17 = vld [vmem:[%s3709_s27 + $0x80] sm:$0xf0]  ;;  %v2880_v18 = vld [vmem:[%s3709_s27 + $0x7c] sm:$0xf]  ;;  %v2633_v19 = vld [vmem:[%s3709_s27 + $0x84] sm:$0xf0] }
  0x5e   : > { %678 = vmatpush.bf16.msra.mxu1 %v2660_v11  ;;  %v2632_v20 = vor.u32 %v2881_v17, %v2631_v16  ;;  %v2636_v21 = vor.u32 %v2880_v18, %v2633_v19  ;;  %v2619_v22 = vld [vmem:[%s3709_s27 + $0x60] sm:$0xf]  ;;  %v2878_v23 = vld [vmem:[%s3709_s27 + $0x68] sm:$0xf0]  ;;  %v2877_v24 = vld [vmem:[%s3709_s27 + $0x64] sm:$0xf] }
  0x5f   : > { %v2621_v25 = vld [vmem:[%s3709_s27 + $0x6c] sm:$0xf0]  ;;  %v2620_v26 = vor.u32 %v2878_v23, %v2619_v22  ;;  %v2607_v28 = vld [vmem:[%s3709_s27 + $0x48] sm:$0xf]  ;;  %v2875_v29 = vld [vmem:[%s3709_s27 + $0x50] sm:$0xf0] }
  0x60   : > { %v2624_v27 = vor.u32 %v2877_v24, %v2621_v25  ;;  %v2874_v30 = vld [vmem:[%s3709_s27 + $0x4c] sm:$0xf]  ;;  %v2609_v31 = vld [vmem:[%s3709_s27 + $0x54] sm:$0xf0]  ;;  %v2608_v32 = vor.u32 %v2875_v29, %v2607_v28  ;;  %v2595_v34 = vld [vmem:[%s3709_s27 + $0x30] sm:$0xf] }
  0x61   : > { %660 = vmatpush.bf16.msra.mxu0 %v2644_v14  ;;  %v2612_v33 = vor.u32 %v2874_v30, %v2609_v31  ;;  %v2872_v35 = vld [vmem:[%s3709_s27 + $0x38] sm:$0xf0]  ;;  %v2871_v36 = vld [vmem:[%s3709_s27 + $0x34] sm:$0xf]  ;;  %v2597_v37 = vld [vmem:[%s3709_s27 + $0x3c] sm:$0xf0] }
  0x62   : > { %679 = vmatpush.bf16.msra.mxu1 %v2648_v15  ;;  %v2596_v38 = vor.u32 %v2872_v35, %v2595_v34  ;;  %v2663_v39 = vld [vmem:[%s3709_s27 + $0xb0] sm:$0xf]  ;;  %v2888_v40 = vld [vmem:[%s3709_s27 + $0xb8] sm:$0xf0]  ;;  %v2651_v41 = vld [vmem:[%s3709_s27 + $0x98] sm:$0xf]  ;;  %v2600_v42 = vor.u32 %v2871_v36, %v2597_v37 }
  0x63   : > { %v2583_v43 = vld [vmem:[%s3709_s27 + $0x18] sm:$0xf]  ;;  %v2869_v44 = vld [vmem:[%s3709_s27 + $0x20] sm:$0xf0]  ;;  %v2664_v45 = vor.u32 %v2888_v40, %v2663_v39  ;;  %v2868_v47 = vld [vmem:[%s3709_s27 + $0x1c] sm:$0xf] }
  0x64   : > { %v2885_v46 = vld [vmem:[%s3709_s27 + $0xa0] sm:$0xf0]  ;;  %v2585_v48 = vld [vmem:[%s3709_s27 + $0x24] sm:$0xf0]  ;;  %v2584_v50 = vor.u32 %v2869_v44, %v2583_v43  ;;  %v2639_v51 = vld [vmem:[%s3709_s27 + $0x80] sm:$0xf] }
  0x65   : > { %661 = vmatpush.bf16.msra.mxu0 %v2632_v20  ;;  %697 = vmatpush.bf16.msra.mxu2 %v2664_v45  ;;  %v2652_v49 = vor.u32 %v2885_v46, %v2651_v41  ;;  %v2882_v52 = vld [vmem:[%s3709_s27 + $0x88] sm:$0xf0]  ;;  %v2588_v53 = vor.u32 %v2868_v47, %v2585_v48  ;;  %v2571_v54 = vld [vmem:[%s3709_s27] sm:$0xf]  ;;  %v2865_v56 = vld [vmem:[%s3709_s27 + $0x4] sm:$0xf] }
  0x66   : > { %680 = vmatpush.bf16.msra.mxu1 %v2636_v21  ;;  %v2866_v55 = vld [vmem:[%s3709_s27 + $0x8] sm:$0xf0]  ;;  %v2573_v57 = vld [vmem:[%s3709_s27 + $0xc] sm:$0xf0]  ;;  %v2640_v59 = vor.u32 %v2882_v52, %v2639_v51  ;;  %v487_v61 = vld [vmem:[#allocation2] sm:$0xff]  ;;  %vm884_vm0 = vcmask 261120  }
  0x67   : > { %v486_v58 = vld [vmem:[#allocation2 + $0x10] sm:$0xff]  ;;  %v2572_v60 = vor.u32 %v2866_v55, %v2571_v54  ;;  %v2627_v62 = vld [vmem:[%s3709_s27 + $0x68] sm:$0xf]  ;;  %v2576_v0 = vor.u32 %v2865_v56, %v2573_v57  ;;  %v2876_v4 = vld [vmem:[%s3709_s27 + $0x58] sm:$0xf0]  ;;  %s3529_s29 = smov 96  }
  0x68   : > { %v2879_v63 = vld [vmem:[%s3709_s27 + $0x70] sm:$0xf0]  ;;  %v490_v1 = vpack.c.bf16 %v487_v61, %v486_v58  ;;  %v2615_v3 = vld [vmem:[%s3709_s27 + $0x50] sm:$0xf]  ;;  %v2603_v6 = vld [vmem:[%s3709_s27 + $0x38] sm:$0xf] }
  0x69   : > { %662 = vmatpush.bf16.msra.mxu0 %v2620_v26  ;;  %698 = vmatpush.bf16.msra.mxu2 %v2652_v49  ;;  %v2628_v2 = vor.u32 %v2879_v63, %v2627_v62  ;;  %v2616_v5 = vor.u32 %v2876_v4, %v2615_v3  ;;  %v2873_v7 = vld [vmem:[%s3709_s27 + $0x40] sm:$0xf0]  ;;  %v2591_v9 = vld [vmem:[%s3709_s27 + $0x20] sm:$0xf]  ;;  %v2870_v10 = vld [vmem:[%s3709_s27 + $0x28] sm:$0xf0] }
  0x6a   : > { %681 = vmatpush.bf16.msra.mxu1 %v2624_v27  ;;  %v2604_v8 = vor.u32 %v2873_v7, %v2603_v6  ;;  %v488_v11 = vld [vmem:[#allocation2 + $0x18] sm:$0xff]  ;;  %v2592_v12 = vor.u32 %v2870_v10, %v2591_v9  ;;  %v489_v13 = vld [vmem:[#allocation2 + $0x8] sm:$0xff]  ;;  %v2867_v15 = vld [vmem:[%s3709_s27 + $0x10] sm:$0xf0]  ;;  %s3530_s8 = smov 64   ;;  %s3531_s21 = smov 32  }
  0x6b   : > { %v2579_v14 = vld [vmem:[%s3709_s27 + $0x8] sm:$0xf]  ;;  %v491_v16 = vpack.c.bf16 %v489_v13, %v488_v11  ;;  %vm1205_vm1 = vcmask 64512   ;;  %vm1401_vm2 = vcmask 1043456   ;;  %vm1755_vm3 = vcmask 523264   ;;  %p2857_p2 = scmp.ne.s32.totalorder %s3512_s24, 1 }
  0x6c   : > { %v2580_v17 = vor.u32 %v2867_v15, %v2579_v14  ;;  %v3781_v18 = vld [vmem:[%s3725_s19] ss:$8 sm:$0x7]  ;;  %vm1760_vm4 = vcmask 785408  }
  0x6d   : > { %663 = vmatpush.bf16.msra.mxu0 %v2608_v32  ;;  %699 = vmatpush.bf16.msra.mxu2 %v2640_v59  ;;  %v525_v19 = vperm.slane %v3781_v18, 0  ;;  %v526_v20 = vperm.slane %v3781_v18, 1  ;;  %v527_v58 = vperm.slane %v3781_v18, 2 }
  0x6e   : > { %682 = vmatpush.bf16.msra.mxu1 %v2612_v33 }
  0x71   : > { %664 = vmatpush.bf16.msra.mxu0 %v2596_v38  ;;  %700 = vmatpush.bf16.msra.mxu2 %v2628_v2 }
  0x72   : > { %683 = vmatpush.bf16.msra.mxu1 %v2600_v42 }
  0x75   : > { %665 = vmatpush.bf16.msra.mxu0 %v2584_v50  ;;  %701 = vmatpush.bf16.msra.mxu2 %v2616_v5 }
  0x76   : > { %684 = vmatpush.bf16.msra.mxu1 %v2588_v53 }
  0x79   : > { %666 = vmatpush.bf16.msra.mxu0 %v2572_v60  ;;  %702 = vmatpush.bf16.msra.mxu2 %v2604_v8 }
  0x7a   : > { %685 = vmatpush.bf16.msra.mxu1 %v2576_v0 }
  0x7c   : > { %667 = vmatmul.bf16.vlgmr.msra.gmra.mxu0 %v490_v1 }
  0x7d   : > { %686 = vmatmul.bf16.vlgmr.msra.gmra.mxu1 %v490_v1  ;;  %703 = vmatpush.bf16.msra.mxu2 %v2592_v12 }
  0x81   : > { %704 = vmatpush.bf16.msra.mxu2 %v2580_v17 }
  0x84   : > { %705 = vmatmul.bf16.vlgmr.msra.gmra.mxu2 %v490_v1 }
  0x8c   : > { %672 = vmatmul.bf16.gmra.mxu0 %v491_v16 }
  0x8d   : > { %691 = vmatmul.bf16.gmra.mxu1 %v491_v16 }
  0x94   : > { %710 = vmatmul.bf16.gmra.mxu2 %v491_v16 }
  0xf9   : > { %v668_v21 = vpop.f32.mrf.mxu0 }
  0xfa   : > { %v669_v22 = vadd.f32 %v668_v21, %v525_v19  ;;  %v687_v23 = vpop.f32.mrf.mxu1 }
  0xfb   : > { %v688_v24 = vadd.f32 %v687_v23, %v526_v20 }
  0xfc   : > { %v756_v31 = vpack.c.bf16 %v669_v22, %v669_v22 }
  0xfd   : > { %v3040_v25 = vpack.i.bf16 %v669_v22, %v688_v24  ;;  %v812_v26 = vpack.c.bf16 %v688_v24, %v688_v24 }
  0xff   : > { %3041 = vrot.lane.b32.xlu0 %v3040_v25, %s3529_s29  ;;  %v889_v27 = vsel %vm884_vm0, %v812_v26, 0 }
 0x100   : > { %898 = vmatpush.bf16.xpose.msra.mxu3 %v889_v27 }
 0x101   : > { %v670_v28 = vpop.f32.mrf.mxu0 }
 0x102   : > { %v689_v29 = vpop.f32.mrf.mxu1  ;;  %v671_v41 = vadd.f32 %v670_v28, %v525_v19 }
 0x103   : > { %v690_v30 = vadd.f32 %v689_v29, %v526_v20 }
 0x104   : > { %v3070_v48 = vpack.i.bf16 %v671_v41, %v669_v22  ;;  %v757_v49 = vpack.c.bf16 %v671_v41, %v671_v41 }
 0x105   : > { %v3060_v32 = vpack.i.bf16 %v690_v30, %v688_v24  ;;  %v813_v33 = vpack.c.bf16 %v690_v30, %v690_v30 }
 0x107   : > { %3061 = vrot.lane.b32.xlu2 %v3060_v32, %s3530_s8  ;;  %2665 = vmatmul.msk.bf16.vlgmr.msra.gmra.mxu3 %vm884_vm0, %v756_v31  ;;  %v908_v34 = vsel %vm884_vm0, %v813_v33, 0  ;;  %v706_v55 = vpop.f32.mrf.mxu2 }
 0x108   : > { %917 = vmatpush.bf16.xpose.msrb.mxu3 %v908_v34  ;;  %v3806_v59 = vadd.f32 %v706_v55, %v527_v58 }
 0x109   : > { %v673_v37 = vpop.f32.mrf.mxu0 }
 0x10a   : > { %v692_v35 = vpop.f32.mrf.mxu1  ;;  %v674_v51 = vadd.f32 %v673_v37, %v525_v19 }
 0x10b   : > { %v693_v36 = vadd.f32 %v692_v35, %v526_v20 }
 0x10c   : > { %v758_v54 = vpack.c.bf16 %v674_v51, %v674_v51 }
 0x10d   : > { %v3045_v38 = vpack.i.bf16 %v693_v36, %v690_v30  ;;  %v814_v39 = vpack.c.bf16 %v693_v36, %v693_v36 }
 0x10f   : > { %3046 = vrot.lane.b32.xlu0 %v3045_v38, %s3529_s29  ;;  %v927_v40 = vsel %vm884_vm0, %v814_v39, 0  ;;  %v708_v57 = vpop.f32.mrf.mxu2  ;;  %v868_v39 = vpack.c.bf16 %v3806_v59, %v3806_v59 }
 0x110   : > { %936 = vmatpush.bf16.xpose.msra.mxu3 %v927_v40  ;;  %v3808_v60 = vadd.f32 %v708_v57, %v527_v58 }
 0x111   : > { %v675_v47 = vpop.f32.mrf.mxu0 }
 0x112   : > { %v694_v42 = vpop.f32.mrf.mxu1  ;;  %v676_v52 = vadd.f32 %v675_v47, %v525_v19  ;;  %v3812_v61 = vpack.i.bf16 %v3808_v60, %v3806_v59 }
 0x113   : > { %v695_v43 = vadd.f32 %v694_v42, %v526_v20 }
 0x114   : > { %v3055_v53 = vpack.i.bf16 %v676_v52, %v674_v51  ;;  %v759_v56 = vpack.c.bf16 %v676_v52, %v676_v52 }
 0x115   : > { %v3065_v44 = vpack.i.bf16 %v695_v43, %v693_v36  ;;  %v3050_v45 = vpack.i.bf16 %v671_v41, %v695_v43  ;;  %v815_v46 = vpack.c.bf16 %v695_v43, %v695_v43 }
 0x117   : > { %3066 = vrot.lane.b32.xlu2 %v3065_v44, %s3530_s8  ;;  %3051 = vrot.lane.b32.xlu1 %v3050_v45, %s3529_s29  ;;  %v946_v50 = vsel %vm884_vm0, %v815_v46, 0  ;;  %v711_v62 = vpop.f32.mrf.mxu2 }
 0x118   : > { %3071 = vrot.lane.b32.xlu0 %v3070_v48, %s3530_s8  ;;  %2666 = vmatmul.msk.bf16.vlgmr.msrb.gmra.mxu3 %vm884_vm0, %v757_v49  ;;  %v3816_v0 = vadd.f32 %v711_v62, %v527_v58 }
 0x119   : > { %955 = vmatpush.bf16.xpose.msrb.mxu3 %v946_v50 }
 0x11f   : > { %3081 = vrot.lane.b32.xlu2 %v3060_v32, %s3531_s21  ;;  %3056 = vrot.lane.b32.xlu1 %v3055_v53, %s3529_s29  ;;  %v713_v63 = vpop.f32.mrf.mxu2 }
 0x120   : > { %3086 = vrot.lane.b32.xlu0 %v3065_v44, %s3531_s21  ;;  %v3818_v1 = vadd.f32 %v713_v63, %v527_v58 }
 0x122   : > { %v3822_v2 = vpack.i.bf16 %v3818_v1, %v3816_v0 }
 0x127   : > { %3096 = vrot.lane.b32.xlu2 %v3055_v53, %s3531_s21  ;;  %3076 = vrot.lane.b32.xlu1 %v3055_v53, %s3530_s8 }
 0x128   : > { %2667 = vmatmul.msk.bf16.vlgmr.msra.gmra.mxu3 %vm884_vm0, %v758_v54  ;;  %3101 = vrot.lane.b32.xlu0 %v3812_v61, %s3529_s29 }
 0x12f   : > { %3091 = vrot.lane.b32.xlu1 %v3070_v48, %s3531_s21  ;;  %3106 = vrot.lane.b32.xlu2 %v3812_v61, %s3530_s8  ;;  %v1403_v48 = vsel %vm1401_vm2, %v868_v39, 0 }
 0x137   : > { %3111 = vrot.lane.b32.xlu1 %v3822_v2, %s3529_s29 }
 0x138   : > { %2668 = vmatmul.msk.bf16.vlgmr.msrb.gmra.mxu3 %vm884_vm0, %v759_v56 }
 0x161   : > { %v3062_v3 = vpop.permute.xlu2 %3061 }
 0x162   : > { %v3063_v4 = vunpack.i.l.bf16 %v3062_v3  ;;  %v3064_v18 = vunpack.i.h.bf16 %v3062_v3 }
 0x164   : > { %v820_v5 = vpack.c.bf16 %v3063_v4, %v3063_v4  ;;  %v821_v23 = vpack.c.bf16 %v3064_v18, %v3064_v18 }
 0x166   : > { %v1041_v6 = vsel %vm884_vm0, %v820_v5, 0  ;;  %v1060_v31 = vsel %vm884_vm0, %v821_v23, 0 }
 0x167   : > { %1050 = vmatpush.bf16.xpose.msrb.mxu0 %v1041_v6  ;;  %v869_v6 = vpack.c.bf16 %v3808_v60, %v3808_v60 }
 0x171   : > { %v3067_v7 = vpop.permute.xlu2 %3066  ;;  %v3042_v8 = vpop.permute.xlu0 %3041 }
 0x172   : > { %v3043_v9 = vunpack.i.l.bf16 %v3042_v8  ;;  %v3044_v12 = vunpack.i.h.bf16 %v3042_v8  ;;  %v3068_v19 = vunpack.i.l.bf16 %v3067_v7  ;;  %v3069_v27 = vunpack.i.h.bf16 %v3067_v7 }
 0x174   : > { %v816_v10 = vpack.c.bf16 %v3043_v9, %v3043_v9  ;;  %v760_v15 = vpack.c.bf16 %v3044_v12, %v3044_v12  ;;  %v822_v24 = vpack.c.bf16 %v3068_v19, %v3068_v19  ;;  %v823_v34 = vpack.c.bf16 %v3069_v27, %v3069_v27 }
 0x176   : > { %v965_v11 = vsel %vm884_vm0, %v816_v10, 0  ;;  %v1079_v32 = vsel %vm884_vm0, %v822_v24, 0  ;;  %v1098_v50 = vsel %vm884_vm0, %v823_v34, 0 }
 0x177   : > { %974 = vmatpush.bf16.xpose.msrb.mxu1 %v965_v11  ;;  %v1422_v11 = vsel %vm1401_vm2, %v869_v6, 0 }
 0x179   : > { %v3082_v13 = vpop.permute.xlu2 %3081 }
 0x17a   : > { %v3083_v14 = vunpack.i.l.bf16 %v3082_v13  ;;  %v3084_v30 = vunpack.i.h.bf16 %v3082_v13 }
 0x17c   : > { %v824_v16 = vpack.c.bf16 %v3083_v14, %v3083_v14  ;;  %v825_v40 = vpack.c.bf16 %v3084_v30, %v3084_v30 }
 0x17e   : > { %2669 = vmatmul.msk.bf16.vlgmr.msrb.gmra.mxu1 %vm884_vm0, %v760_v15  ;;  %v1117_v17 = vsel %vm884_vm0, %v824_v16, 0  ;;  %v1136_v49 = vsel %vm884_vm0, %v825_v40, 0 }
 0x17f   : > { %1126 = vmatpush.bf16.xpose.msra.mxu0 %v1117_v17 }
 0x181   : > { %v3047_v20 = vpop.permute.xlu0 %3046  ;;  %v3097_v24 = vpop.permute.xlu2 %3096 }
 0x182   : > { %v3049_v21 = vunpack.i.h.bf16 %v3047_v20  ;;  %v3048_v22 = vunpack.i.l.bf16 %v3047_v20  ;;  %v3098_v27 = vunpack.i.l.bf16 %v3097_v24 }
 0x184   : > { %v818_v25 = vpack.c.bf16 %v3049_v21, %v3049_v21  ;;  %v817_v26 = vpack.c.bf16 %v3048_v22, %v3048_v22  ;;  %v770_v30 = vpack.c.bf16 %v3098_v27, %v3098_v27 }
 0x186   : > { %v984_v28 = vsel %vm884_vm0, %v817_v26, 0  ;;  %v1003_v29 = vsel %vm884_vm0, %v818_v25, 0  ;;  %v3099_v26 = vunpack.i.h.bf16 %v3097_v24 }
 0x187   : > { %993 = vmatpush.bf16.xpose.msra.mxu1 %v984_v28  ;;  %1012 = vmatpush.bf16.xpose.msrb.mxu2 %v1003_v29 }
 0x188   : > { %v771_v29 = vpack.c.bf16 %v3099_v26, %v3099_v26 }
 0x189   : > { %v3052_v33 = vpop.permute.xlu1 %3051 }
 0x18a   : > { %v3054_v35 = vunpack.i.h.bf16 %v3052_v33  ;;  %v3053_v36 = vunpack.i.l.bf16 %v3052_v33  ;;  %v3072_v37 = vpop.permute.xlu0 %3071  ;;  %v900_v38 = vpop.f32.mrf.mxu3 }
 0x18b   : > { %v3073_v41 = vunpack.i.l.bf16 %v3072_v37  ;;  %v3838_v42 = vmul.f32 0.17677669, %v900_v38  ;;  %v3074_v5 = vunpack.i.h.bf16 %v3072_v37 }
 0x18c   : > { %v761_v43 = vpack.c.bf16 %v3054_v35, %v3054_v35  ;;  %v819_v44 = vpack.c.bf16 %v3053_v36, %v3053_v36  ;;  %v870_v35 = vpack.c.bf16 %v3816_v0, %v3816_v0  ;;  %v871_v36 = vpack.c.bf16 %v3818_v1, %v3818_v1 }
 0x18d   : > { %v764_v45 = vpack.c.bf16 %v3073_v41, %v3073_v41  ;;  %v1206_v46 = vsel %vm1205_vm1, %v3838_v42, -inf  ;;  %v765_v9 = vpack.c.bf16 %v3074_v5, %v3074_v5 }
 0x18e   : > { %2670 = vmatmul.msk.bf16.vlgmr.msra.gmra.mxu1 %vm884_vm0, %v761_v43  ;;  %1207 = vmax.xlane.f32.xlu0 %v1206_v46  ;;  %v1022_v47 = vsel %vm884_vm0, %v819_v44, 0  ;;  %v1441_v37 = vsel %vm1401_vm2, %v870_v35, 0  ;;  %v1460_v38 = vsel %vm1401_vm2, %v871_v36, 0 }
 0x18f   : > { %1069 = vmatpush.bf16.xpose.msrb.mxu1 %v1060_v31  ;;  %1088 = vmatpush.bf16.xpose.msra.mxu2 %v1079_v32 }
 0x190   : > { %2673 = vmatmul.msk.bf16.vlgmr.msrb.gmra.mxu0 %vm884_vm0, %v764_v45  ;;  %1031 = vmatpush.bf16.xpose.msra.mxu3 %v1022_v47 }
 0x191   : > { %v3057_v51 = vpop.permute.xlu1 %3056  ;;  %1412 = vmatpush.bf16.msrb.mxu0 %v1403_v48 }
 0x192   : > { %v3059_v52 = vunpack.i.h.bf16 %v3057_v51  ;;  %v3058_v53 = vunpack.i.l.bf16 %v3057_v51  ;;  %v3087_v54 = vpop.permute.xlu0 %3086  ;;  %v902_v55 = vpop.f32.mrf.mxu3 }
 0x193   : > { %v3089_v56 = vunpack.i.h.bf16 %v3087_v54  ;;  %v3088_v57 = vunpack.i.l.bf16 %v3087_v54 }
 0x194   : > { %v763_v58 = vpack.c.bf16 %v3059_v52, %v3059_v52  ;;  %v762_v59 = vpack.c.bf16 %v3058_v53, %v3058_v53 }
 0x195   : > { %v827_v62 = vpack.c.bf16 %v3089_v56, %v3089_v56  ;;  %v826_v63 = vpack.c.bf16 %v3088_v57, %v3088_v57 }
 0x196   : > { %2671 = vmatmul.msk.bf16.vlgmr.msrb.gmra.mxu2 %vm884_vm0, %v762_v59 }
 0x197   : > { %1145 = vmatpush.bf16.xpose.msra.mxu1 %v1136_v49  ;;  %2672 = vmatmul.msk.bf16.vlgmr.msra.gmra.mxu3 %vm884_vm0, %v763_v58  ;;  %v1155_v3 = vsel %vm884_vm0, %v826_v63, 0  ;;  %v1174_v4 = vsel %vm884_vm0, %v827_v62, 0 }
 0x198   : > { %1107 = vmatpush.bf16.xpose.msrb.mxu3 %v1098_v50  ;;  %1164 = vmatpush.bf16.xpose.msrb.mxu2 %v1155_v3 }
 0x199   : > { %v3077_v7 = vpop.permute.xlu1 %3076 }
 0x19a   : > { %v3079_v13 = vunpack.i.h.bf16 %v3077_v7  ;;  %v3078_v14 = vunpack.i.l.bf16 %v3077_v7  ;;  %v3102_v39 = vpop.permute.xlu0 %3101 }
 0x19b   : > { %v919_v8 = vpop.f32.mrf.mxu3  ;;  %v3104_v40 = vunpack.i.h.bf16 %v3102_v39  ;;  %v3103_v41 = vunpack.i.l.bf16 %v3102_v39 }
 0x19c   : > { %v3854_v10 = vmul.f32 0.17677669, %v919_v8  ;;  %v767_v60 = vpack.c.bf16 %v3079_v13, %v3079_v13  ;;  %v766_v18 = vpack.c.bf16 %v3078_v14, %v3078_v14 }
 0x19d   : > { %v873_v43 = vpack.c.bf16 %v3104_v40, %v3104_v40  ;;  %v872_v44 = vpack.c.bf16 %v3103_v41, %v3103_v41 }
 0x19e   : > { %2674 = vmatmul.msk.bf16.vlgmr.msrb.gmra.mxu1 %vm884_vm0, %v765_v9  ;;  %v1209_v12 = vsel %vm1205_vm1, %v3854_v10, -inf }
 0x19f   : > { %1210 = vmax.xlane.f32.xlu1 %v1209_v12  ;;  %1431 = vmatpush.bf16.msrb.mxu1 %v1422_v11  ;;  %v1479_v47 = vsel %vm1401_vm2, %v872_v44, 0  ;;  %v1498_v0 = vsel %vm1401_vm2, %v873_v43, 0  ;;  %v3905_v11 = vpop.permute.xlu2 %3106 }
 0x1a0   : > { %1183 = vmatpush.bf16.xpose.msra.mxu3 %v1174_v4 }
 0x1a1   : > { %v3092_v15 = vpop.permute.xlu1 %3091 }
 0x1a2   : > { %v3093_v16 = vunpack.i.l.bf16 %v3092_v15  ;;  %v3094_v20 = vunpack.i.h.bf16 %v3092_v15 }
 0x1a3   : > { %v921_v17 = vpop.f32.mrf.mxu3 }
 0x1a4   : > { %v768_v19 = vpack.c.bf16 %v3093_v16, %v3093_v16  ;;  %v769_v22 = vpack.c.bf16 %v3094_v20, %v3094_v20 }
 0x1a6   : > { %2675 = vmatmul.msk.bf16.vlgmr.msra.gmra.mxu2 %vm884_vm0, %v766_v18  ;;  %2677 = vmatmul.msk.bf16.vlgmr.msra.gmra.mxu0 %vm884_vm0, %v768_v19 }
 0x1a7   : > { %2676 = vmatmul.msk.bf16.vlgmr.msrb.gmra.mxu3 %vm884_vm0, %v767_v60  ;;  %1450 = vmatpush.bf16.msra.mxu2 %v1441_v37 }
 0x1a8   : > { %1469 = vmatpush.bf16.msrb.mxu3 %v1460_v38  ;;  %1488 = vmatpush.bf16.msra.mxu0 %v1479_v47 }
 0x1a9   : > { %v3903_v7 = vpop.permute.xlu1 %3111 }
 0x1ab   : > { %v938_v21 = vpop.f32.mrf.mxu3 }
 0x1ac   : > { %v3863_v23 = vmul.f32 0.17677669, %v938_v21 }
 0x1ae   : > { %2678 = vmatmul.msk.bf16.vlgmr.msra.gmra.mxu1 %vm884_vm0, %v769_v22  ;;  %v1212_v25 = vsel %vm1205_vm1, %v3863_v23, -inf }
 0x1af   : > { %1213 = vmax.xlane.f32.xlu2 %v1212_v25  ;;  %1507 = vmatpush.bf16.msra.mxu1 %v1498_v0 }
 0x1b3   : > { %v940_v28 = vpop.f32.mrf.mxu3 }
 0x1b6   : > { %2679 = vmatmul.msk.bf16.vlgmr.msrb.gmra.mxu2 %vm884_vm0, %v770_v30 }
 0x1b7   : > { %2680 = vmatmul.msk.bf16.vlgmr.msra.gmra.mxu3 %vm884_vm0, %v771_v29 }
 0x1bb   : > { %v957_v31 = vpop.f32.mrf.mxu3 }
 0x1bc   : > { %v3870_v32 = vmul.f32 0.17677669, %v957_v31 }
 0x1be   : > { %v1215_v33 = vsel %vm1205_vm1, %v3870_v32, -inf }
 0x1bf   : > { %1216 = vmax.xlane.f32.xlu2 %v1215_v33 }
 0x1c3   : > { %v959_v34 = vpop.f32.mrf.mxu3 }
 0x1fb   : > { %v976_v45 = vpop.f32.mrf.mxu1 }
 0x1fc   : > { %v3880_v46 = vmul.f32 0.17677669, %v976_v45 }
 0x1fe   : > { %v1218_v1 = vsel %vm1205_vm1, %v3880_v46, -inf }
 0x1ff   : > { %1219 = vmax.xlane.f32.xlu0 %v1218_v1 }
 0x201   : > { %v1208_v49 = vpop.xlane.xlu0 %1207 }
 0x202   : > { %v1254_v53 = vsub.f32 %v3838_v42, %v1208_v49 }
 0x203   : > { %v978_v48 = vpop.f32.mrf.mxu1 }
 0x204   : > { %v1270_v55 = vmul.f32 1.442695, %v1254_v53 }
 0x206   : > { %3160 = vpow2.f32 %v1270_v55  ;;  %v3114_v55 = vunpack.i.h.bf16 %v3903_v7 }
 0x20b   : > { %v995_v50 = vpop.f32.mrf.mxu1 }
 0x20c   : > { %v3891_v56 = vmul.f32 0.17677669, %v995_v50  ;;  %v3897_v42 = vpop.eup %3160 }
 0x20d   : > { %v1052_v51 = vpop.f32.mrf.mxu0  ;;  %v1302_v6 = vsel %vm1205_vm1, %v3897_v42, 0.0 }
 0x20e   : > { %v3886_v52 = vmul.f32 0.17677669, %v1052_v51  ;;  %v1221_v59 = vsel %vm1205_vm1, %v3891_v56, -inf }
 0x210   : > { %v1230_v54 = vsel %vm1205_vm1, %v3886_v52, -inf }
 0x211   : > { %1231 = vmax.xlane.f32.xlu1 %v1230_v54 }
 0x212   : > { %v1211_v20 = vpop.xlane.xlu1 %1210 }
 0x213   : > { %v997_v57 = vpop.f32.mrf.mxu1  ;;  %v1255_v27 = vsub.f32 %v3854_v10, %v1211_v20 }
 0x214   : > { %v3113_v57 = vunpack.i.l.bf16 %v3903_v7 }
 0x215   : > { %v1054_v58 = vpop.f32.mrf.mxu0  ;;  %v1272_v33 = vmul.f32 1.442695, %v1255_v27 }
 0x216   : > { %v875_v58 = vpack.c.bf16 %v3114_v55, %v3114_v55 }
 0x217   : > { %3162 = vpow2.f32 %v1272_v33 }
 0x219   : > { %1222 = vmax.xlane.f32.xlu1 %v1221_v59  ;;  %v1014_v62 = vpop.f32.mrf.mxu2  ;;  %v874_v59 = vpack.c.bf16 %v3113_v57, %v3113_v57 }
 0x21a   : > { %v1033_v63 = vpop.f32.mrf.mxu3  ;;  %v3915_v21 = vmul.f32 0.17677669, %v1014_v62 }
 0x21b   : > { %v3895_v3 = vmul.f32 0.17677669, %v1033_v63  ;;  %v1071_v4 = vpop.f32.mrf.mxu1  ;;  %v1517_v62 = vsel %vm1401_vm2, %v874_v59, 0  ;;  %v1536_v63 = vsel %vm1401_vm2, %v875_v58, 0 }
 0x21c   : > { %v1224_v28 = vsel %vm1205_vm1, %v3915_v21, -inf  ;;  %v3926_v35 = vmul.f32 0.17677669, %v1071_v4  ;;  %1526 = vmatpush.bf16.msrb.mxu2 %v1517_v62  ;;  %1545 = vmatpush.bf16.msra.mxu3 %v1536_v63 }
 0x21d   : > { %v1227_v5 = vsel %vm1205_vm1, %v3895_v3, -inf }
 0x21e   : > { %1228 = vmax.xlane.f32.xlu0 %v1227_v5  ;;  %v1233_v40 = vsel %vm1205_vm1, %v3926_v35, -inf }
 0x221   : > { %1303 = vadd.xlane.f32.xlu1 %v1302_v6  ;;  %v1016_v8 = vpop.f32.mrf.mxu2 }
 0x222   : > { %v1035_v9 = vpop.f32.mrf.mxu3  ;;  %v1214_v60 = vpop.xlane.xlu2 %1213 }
 0x223   : > { %v1073_v12 = vpop.f32.mrf.mxu1  ;;  %v1128_v13 = vpop.f32.mrf.mxu0  ;;  %v1256_v10 = vsub.f32 %v3863_v23, %v1214_v60 }
 0x224   : > { %v3907_v14 = vmul.f32 0.17677669, %v1128_v13 }
 0x225   : > { %v1274_v44 = vmul.f32 1.442695, %v1256_v10 }
 0x226   : > { %v1242_v15 = vsel %vm1205_vm1, %v3907_v14, -inf }
 0x227   : > { %1243 = vmax.xlane.f32.xlu2 %v1242_v15 }
 0x229   : > { %v1090_v16 = vpop.f32.mrf.mxu2 }
 0x22a   : > { %v1109_v17 = vpop.f32.mrf.mxu3  ;;  %v3911_v18 = vmul.f32 0.17677669, %v1090_v16 }
 0x22b   : > { %v3913_v19 = vmul.f32 0.17677669, %v1109_v17  ;;  %v1147_v22 = vpop.f32.mrf.mxu1  ;;  %v1130_v24 = vpop.f32.mrf.mxu0 }
 0x22c   : > { %v1236_v25 = vsel %vm1205_vm1, %v3911_v18, -inf  ;;  %v3924_v29 = vmul.f32 0.17677669, %v1147_v22 }
 0x22d   : > { %v1239_v26 = vsel %vm1205_vm1, %v3913_v19, -inf  ;;  %1237 = vmax.xlane.f32.xlu0 %v1236_v25 }
 0x22e   : > { %1240 = vmax.xlane.f32.xlu1 %v1239_v26  ;;  %v1245_v38 = vsel %vm1205_vm1, %v3924_v29, -inf  ;;  %v3108_v26 = vunpack.i.l.bf16 %v3905_v11 }
 0x22f   : > { %1225 = vmax.xlane.f32.xlu2 %v1224_v28 }
 0x230   : > { %v876_v28 = vpack.c.bf16 %v3108_v26, %v3108_v26 }
 0x231   : > { %v1092_v30 = vpop.f32.mrf.mxu2 }
 0x232   : > { %v1111_v31 = vpop.f32.mrf.mxu3  ;;  %v1217_v34 = vpop.xlane.xlu2 %1216 }
 0x233   : > { %v1257_v36 = vsub.f32 %v3870_v32, %v1217_v34  ;;  %v1149_v37 = vpop.f32.mrf.mxu1  ;;  %v3938_v32 = vpop.eup %3162  ;;  %v1555_v34 = vsel %vm1401_vm2, %v876_v28, 0 }
 0x234   : > { %v1305_v1 = vsel %vm1205_vm1, %v3938_v32, 0.0 }
 0x235   : > { %1246 = vmax.xlane.f32.xlu0 %v1245_v38  ;;  %v1276_v39 = vmul.f32 1.442695, %v1257_v36 }
 0x237   : > { %1234 = vmax.xlane.f32.xlu2 %v1233_v40  ;;  %3164 = vpow2.f32 %v1276_v39 }
 0x238   : > { %3166 = vpow2.f32 %v1274_v44 }
 0x239   : > { %v1166_v41 = vpop.f32.mrf.mxu2 }
 0x23a   : > { %v1185_v43 = vpop.f32.mrf.mxu3  ;;  %v3934_v45 = vmul.f32 0.17677669, %v1166_v41 }
 0x23b   : > { %v3936_v47 = vmul.f32 0.17677669, %v1185_v43 }
 0x23c   : > { %v1248_v0 = vsel %vm1205_vm1, %v3934_v45, -inf }
 0x23d   : > { %v1251_v23 = vsel %vm1205_vm1, %v3936_v47, -inf  ;;  %1249 = vmax.xlane.f32.xlu0 %v1248_v0  ;;  %v3946_v48 = vpop.eup %3164 }
 0x23e   : > { %1252 = vmax.xlane.f32.xlu1 %v1251_v23  ;;  %v3948_v51 = vpop.eup %3166  ;;  %v1311_v53 = vsel %vm1205_vm1, %v3946_v48, 0.0 }
 0x23f   : > { %1306 = vadd.xlane.f32.xlu2 %v1305_v1  ;;  %v1308_v54 = vsel %vm1205_vm1, %v3948_v51, 0.0 }
 0x241   : > { %v1168_v49 = vpop.f32.mrf.mxu2 }
 0x242   : > { %v1187_v50 = vpop.f32.mrf.mxu3 }
 0x245   : > { %1312 = vadd.xlane.f32.xlu0 %v1311_v53 }
 0x247   : > { %1309 = vadd.xlane.f32.xlu2 %v1308_v54 }
 0x272   : > { %v1220_v4 = vpop.xlane.xlu0 %1219 }
 0x273   : > { %v1258_v5 = vsub.f32 %v3880_v46, %v1220_v4  ;;  %v3109_v4 = vunpack.i.h.bf16 %v3905_v11 }
 0x275   : > { %v1278_v6 = vmul.f32 1.442695, %v1258_v5 }
 0x277   : > { %3168 = vpow2.f32 %v1278_v6 }
 0x27d   : > { %v3959_v8 = vpop.eup %3168 }
 0x27e   : > { %v1314_v9 = vsel %vm1205_vm1, %v3959_v8, 0.0 }
 0x27f   : > { %1315 = vadd.xlane.f32.xlu1 %v1314_v9 }
 0x284   : > { %v1232_v7 = vpop.xlane.xlu1 %1231 }
 0x285   : > { %v1262_v12 = vsub.f32 %v3886_v52, %v1232_v7 }
 0x287   : > { %v1286_v13 = vmul.f32 1.442695, %v1262_v12  ;;  %v877_v12 = vpack.c.bf16 %v3109_v4, %v3109_v4 }
 0x289   : > { %3170 = vpow2.f32 %v1286_v13 }
 0x28c   : > { %v1223_v15 = vpop.xlane.xlu1 %1222 }
 0x28d   : > { %v1259_v16 = vsub.f32 %v3891_v56, %v1223_v15 }
 0x28f   : > { %v3965_v17 = vpop.eup %3170  ;;  %v1280_v60 = vmul.f32 1.442695, %v1259_v16 }
 0x290   : > { %v1326_v46 = vsel %vm1205_vm1, %v3965_v17, 0.0 }
 0x291   : > { %3172 = vpow2.f32 %v1280_v60  ;;  %1327 = vadd.xlane.f32.xlu2 %v1326_v46  ;;  %v1229_v20 = vpop.xlane.xlu0 %1228 }
 0x292   : > { %v1261_v22 = vsub.f32 %v3895_v3, %v1229_v20  ;;  %v1574_v20 = vsel %vm1401_vm2, %v877_v12, 0 }
 0x294   : > { %v1284_v24 = vmul.f32 1.442695, %v1261_v22  ;;  %v1304_v25 = vpop.xlane.xlu1 %1303 }
 0x295   : > { %3174 = vrcp.f32 %v1304_v25 }
 0x296   : > { %3176 = vpow2.f32 %v1284_v24 }
 0x297   : > { %v3970_v52 = vpop.eup %3172 }
 0x298   : > { %v1317_v56 = vsel %vm1205_vm1, %v3970_v52, 0.0 }
 0x299   : > { %1318 = vadd.xlane.f32.xlu2 %v1317_v56 }
 0x29a   : > { %v1244_v31 = vpop.xlane.xlu2 %1243 }
 0x29b   : > { %v3175_v27 = vpop.eup %3174  ;;  %v1266_v41 = vsub.f32 %v3907_v14, %v1244_v31 }
 0x29c   : > { %v1366_v30 = vmul.f32 %v3175_v27, %v3897_v42  ;;  %v3976_v33 = vpop.eup %3176 }
 0x29d   : > { %v1323_v36 = vsel %vm1205_vm1, %v3976_v33, 0.0  ;;  %v1294_v0 = vmul.f32 1.442695, %v1266_v41 }
 0x29e   : > { %v1382_v3 = vpack.c.bf16 %v1366_v30, %v1366_v30 }
 0x2a0   : > { %2681 = vmatmul.msk.bf16.vlgmr.msrb.gmra.mxu0 %vm1205_vm1, %v1382_v3  ;;  %v1238_v37 = vpop.xlane.xlu0 %1237 }
 0x2a1   : > { %1564 = vmatpush.bf16.msrb.mxu0 %v1555_v34  ;;  %1324 = vadd.xlane.f32.xlu2 %v1323_v36  ;;  %v1241_v38 = vpop.xlane.xlu1 %1240 }
 0x2a2   : > { %v1265_v10 = vsub.f32 %v3913_v19, %v1241_v38  ;;  %v1226_v40 = vpop.xlane.xlu2 %1225 }
 0x2a3   : > { %v1260_v42 = vsub.f32 %v3915_v21, %v1226_v40  ;;  %v1264_v21 = vsub.f32 %v3911_v18, %v1238_v37 }
 0x2a4   : > { %v1292_v39 = vmul.f32 1.442695, %v1265_v10 }
 0x2a5   : > { %v1282_v43 = vmul.f32 1.442695, %v1260_v42 }
 0x2a6   : > { %3178 = vpow2.f32 %v1292_v39 }
 0x2a7   : > { %3180 = vpow2.f32 %v1282_v43 }
 0x2a8   : > { %v3985_v44 = vpop.xlane.xlu0 %1246  ;;  %3182 = vpow2.f32 %v1294_v0 }
 0x2aa   : > { %v1235_v23 = vpop.xlane.xlu2 %1234 }
 0x2ab   : > { %v1263_v49 = vsub.f32 %v3926_v35, %v1235_v23  ;;  %v1290_v35 = vmul.f32 1.442695, %v1264_v21 }
 0x2ac   : > { %v3987_v1 = vpop.eup %3178 }
 0x2ad   : > { %v1335_v19 = vsel %vm1205_vm1, %v3987_v1, 0.0  ;;  %v3992_v50 = vpop.eup %3180  ;;  %v1288_v14 = vmul.f32 1.442695, %v1263_v49 }
 0x2ae   : > { %1336 = vadd.xlane.f32.xlu2 %v1335_v19  ;;  %v1320_v53 = vsel %vm1205_vm1, %v3992_v50, 0.0  ;;  %v3999_v63 = vpop.eup %3182 }
 0x2af   : > { %3184 = vpow2.f32 %v1288_v14  ;;  %1321 = vadd.xlane.f32.xlu1 %v1320_v53 }
 0x2b0   : > { %v1250_v54 = vpop.xlane.xlu0 %1249 }
 0x2b1   : > { %v1253_v55 = vpop.xlane.xlu1 %1252  ;;  %v1268_v57 = vsub.f32 %v3934_v45, %v1250_v54  ;;  %v1338_v45 = vsel %vm1205_vm1, %v3999_v63, 0.0 }
 0x2b2   : > { %v1269_v59 = vsub.f32 %v3936_v47, %v1253_v55  ;;  %v1307_v62 = vpop.xlane.xlu2 %1306 }
 0x2b3   : > { %v1298_v58 = vmul.f32 1.442695, %v1268_v57  ;;  %3186 = vrcp.f32 %v1307_v62 }
 0x2b4   : > { %v1300_v5 = vmul.f32 1.442695, %v1269_v59 }
 0x2b5   : > { %3188 = vpow2.f32 %v1298_v58  ;;  %v4001_v18 = vpop.eup %3184 }
 0x2b6   : > { %3190 = vpow2.f32 %v1290_v35  ;;  %v1329_v6 = vsel %vm1205_vm1, %v4001_v18, 0.0 }
 0x2b7   : > { %1330 = vadd.xlane.f32.xlu0 %v1329_v6  ;;  %1339 = vadd.xlane.f32.xlu1 %v1338_v45 }
 0x2b8   : > { %v1313_v47 = vpop.xlane.xlu0 %1312 }
 0x2b9   : > { %3192 = vrcp.f32 %v1313_v47  ;;  %v3187_v9 = vpop.eup %3186 }
 0x2ba   : > { %3194 = vpow2.f32 %v1300_v5  ;;  %v1367_v13 = vmul.f32 %v3187_v9, %v3938_v32  ;;  %v1310_v15 = vpop.xlane.xlu2 %1309 }
 0x2bb   : > { %v4008_v7 = vpop.eup %3188  ;;  %3196 = vrcp.f32 %v1310_v15 }
 0x2bc   : > { %v4011_v11 = vpop.eup %3190  ;;  %v1344_v16 = vsel %vm1205_vm1, %v4008_v7, 0.0  ;;  %v1383_v60 = vpack.c.bf16 %v1367_v13, %v1367_v13 }
 0x2bd   : > { %1345 = vadd.xlane.f32.xlu2 %v1344_v16  ;;  %v1332_v22 = vsel %vm1205_vm1, %v4011_v11, 0.0 }
 0x2be   : > { %2682 = vmatmul.msk.bf16.vlgmr.msrb.gmra.mxu1 %vm1205_vm1, %v1383_v60 }
 0x2bf   : > { %v3193_v46 = vpop.eup %3192  ;;  %1583 = vmatpush.bf16.msrb.mxu1 %v1574_v20  ;;  %1333 = vadd.xlane.f32.xlu1 %v1332_v22 }
 0x2c0   : > { %v1369_v24 = vmul.f32 %v3193_v46, %v3946_v48  ;;  %v4020_v32 = vpop.eup %3194  ;;  %v1267_v48 = vsub.f32 %v3924_v29, %v3985_v44 }
 0x2c1   : > { %v3197_v25 = vpop.eup %3196  ;;  %v1347_v27 = vsel %vm1205_vm1, %v4020_v32, 0.0 }
 0x2c2   : > { %v1385_v26 = vpack.c.bf16 %v1369_v24, %v1369_v24  ;;  %v1368_v56 = vmul.f32 %v3197_v25, %v3948_v51  ;;  %v1296_v51 = vmul.f32 1.442695, %v1267_v48 }
 0x2c4   : > { %2684 = vmatmul.msk.bf16.vlgmr.msrb.gmra.mxu3 %vm1205_vm1, %v1385_v26  ;;  %v1384_v28 = vpack.c.bf16 %v1368_v56, %v1368_v56  ;;  %3198 = vpow2.f32 %v1296_v51 }
 0x2c5   : > { %1348 = vadd.xlane.f32.xlu2 %v1347_v27 }
 0x2c6   : > { %2683 = vmatmul.msk.bf16.vlgmr.msra.gmra.mxu2 %vm1205_vm1, %v1384_v28 }
 0x2ca   : > { %v4035_v30 = vpop.eup %3198 }
 0x2cb   : > { %3116 = vrot.lane.b32.xlu0 %v3822_v2, %s3530_s8  ;;  %v1341_v3 = vsel %vm1205_vm1, %v4035_v30, 0.0 }
 0x2d8   : > { %3121 = vrot.lane.b32.xlu1 %v3812_v61, %s3531_s21 }
 0x2dd   : > { %3126 = vrot.lane.b32.xlu2 %v3822_v2, %s3531_s21 }
 0x2f2   : > { %v1316_v31 = vpop.xlane.xlu1 %1315 }
 0x2f3   : > { %3200 = vrcp.f32 %v1316_v31 }
 0x2f5   : > { %1342 = vadd.xlane.f32.xlu0 %v1341_v3 }
 0x2f9   : > { %v3201_v34 = vpop.eup %3200 }
 0x2fa   : > { %v1370_v36 = vmul.f32 %v3201_v34, %v3959_v8 }
 0x2fc   : > { %v1386_v61 = vpack.c.bf16 %v1370_v36, %v1370_v36 }
 0x2fe   : > { %2685 = vmatmul.msk.bf16.vlgmr.msra.gmra.mxu0 %vm1205_vm1, %v1386_v61 }
 0x304   : > { %v1328_v2 = vpop.xlane.xlu2 %1327 }
 0x305   : > { %3202 = vrcp.f32 %v1328_v2 }
 0x30b   : > { %v3203_v37 = vpop.eup %3202 }
 0x30c   : > { %v1374_v29 = vmul.f32 %v3203_v37, %v3965_v17  ;;  %v1319_v38 = vpop.xlane.xlu2 %1318 }
 0x30d   : > { %3204 = vrcp.f32 %v1319_v38 }
 0x30e   : > { %v1390_v10 = vpack.c.bf16 %v1374_v29, %v1374_v29 }
 0x310   : > { %2689 = vmatmul.msk.bf16.vlgmr.msrb.gmra.mxu0 %vm1205_vm1, %v1390_v10 }
 0x313   : > { %v3205_v39 = vpop.eup %3204 }
 0x314   : > { %v1371_v40 = vmul.f32 %v3205_v39, %v3970_v52  ;;  %v1325_v42 = vpop.xlane.xlu2 %1324 }
 0x315   : > { %3206 = vrcp.f32 %v1325_v42 }
 0x316   : > { %v1387_v41 = vpack.c.bf16 %v1371_v40, %v1371_v40 }
 0x318   : > { %2686 = vmatmul.msk.bf16.vlgmr.msra.gmra.mxu1 %vm1205_vm1, %v1387_v41 }
 0x31b   : > { %v3207_v8 = vpop.eup %3206 }
 0x31c   : > { %v1373_v43 = vmul.f32 %v3207_v8, %v3976_v33 }
 0x31d   : > { %v4046_v44 = vpop.f32.mrf.mxu0 }
 0x31e   : > { %v1389_v0 = vpack.c.bf16 %v1373_v43, %v1373_v43 }
 0x320   : > { %2688 = vmatmul.msk.bf16.vlgmr.msra.gmra.mxu3 %vm1205_vm1, %v1389_v0 }
 0x321   : > { %v1337_v49 = vpop.xlane.xlu2 %1336 }
 0x322   : > { %v1322_v17 = vpop.xlane.xlu1 %1321 }
 0x323   : > { %3208 = vrcp.f32 %v1322_v17 }
 0x325   : > { %v1416_v23 = vpop.f32.mrf.mxu0 }
 0x329   : > { %v3209_v19 = vpop.eup %3208 }
 0x32a   : > { %v1372_v52 = vmul.f32 %v3209_v19, %v3992_v50  ;;  %v1331_v21 = vpop.xlane.xlu0 %1330  ;;  %v1340_v14 = vpop.xlane.xlu1 %1339 }
 0x32b   : > { %3210 = vrcp.f32 %v1331_v21 }
 0x32c   : > { %v1388_v53 = vpack.c.bf16 %v1372_v52, %v1372_v52  ;;  %3212 = vrcp.f32 %v1337_v49 }
 0x32e   : > { %2687 = vmatmul.msk.bf16.vlgmr.msrb.gmra.mxu2 %vm1205_vm1, %v1388_v53 }
 0x330   : > { %v1346_v54 = vpop.xlane.xlu2 %1345 }
 0x331   : > { %v3211_v33 = vpop.eup %3210 }
 0x332   : > { %v1375_v55 = vmul.f32 %v3211_v33, %v4001_v18  ;;  %v1334_v57 = vpop.xlane.xlu1 %1333  ;;  %v3213_v59 = vpop.eup %3212 }
 0x333   : > { %3214 = vrcp.f32 %v1334_v57  ;;  %v1377_v45 = vmul.f32 %v3213_v59, %v3987_v1 }
 0x334   : > { %v1391_v35 = vpack.c.bf16 %v1375_v55, %v1375_v55  ;;  %3216 = vrcp.f32 %v1340_v14 }
 0x335   : > { %v1393_v22 = vpack.c.bf16 %v1377_v45, %v1377_v45  ;;  %3218 = vrcp.f32 %v1346_v54 }
 0x336   : > { %2690 = vmatmul.msk.bf16.vlgmr.msrb.gmra.mxu1 %vm1205_vm1, %v1391_v35 }
 0x338   : > { %v1349_v58 = vpop.xlane.xlu2 %1348 }
 0x339   : > { %v3215_v50 = vpop.eup %3214  ;;  %3220 = vrcp.f32 %v1349_v58 }
 0x33a   : > { %v1376_v47 = vmul.f32 %v3215_v50, %v4011_v11  ;;  %v3217_v27 = vpop.eup %3216 }
 0x33b   : > { %v4053_v62 = vpop.f32.mrf.mxu1  ;;  %v3219_v31 = vpop.eup %3218  ;;  %v1378_v34 = vmul.f32 %v3217_v27, %v3999_v63 }
 0x33c   : > { %v1392_v25 = vpack.c.bf16 %v1376_v47, %v1376_v47  ;;  %v1380_v38 = vmul.f32 %v3219_v31, %v4008_v7 }
 0x33d   : > { %v3117_v4 = vpop.permute.xlu0 %3116  ;;  %v1394_v39 = vpack.c.bf16 %v1378_v34, %v1378_v34 }
 0x33e   : > { %v3119_v5 = vunpack.i.h.bf16 %v3117_v4  ;;  %v3118_v6 = vunpack.i.l.bf16 %v3117_v4  ;;  %v1396_v42 = vpack.c.bf16 %v1380_v38, %v1380_v38 }
 0x33f   : > { %v3221_v3 = vpop.eup %3220 }
 0x340   : > { %v3127_v9 = vpop.permute.xlu2 %3126  ;;  %v879_v18 = vpack.c.bf16 %v3119_v5, %v3119_v5  ;;  %v878_v12 = vpack.c.bf16 %v3118_v6, %v3118_v6  ;;  %v1381_v10 = vmul.f32 %v3221_v3, %v4020_v32 }
 0x341   : > { %v3129_v13 = vunpack.i.h.bf16 %v3127_v9  ;;  %v3128_v15 = vunpack.i.l.bf16 %v3127_v9 }
 0x342   : > { %v1593_v46 = vsel %vm1401_vm2, %v878_v12, 0  ;;  %v1612_v20 = vsel %vm1401_vm2, %v879_v18, 0  ;;  %v1397_v41 = vpack.c.bf16 %v1381_v10, %v1381_v10 }
 0x343   : > { %v883_v16 = vpack.c.bf16 %v3129_v13, %v3129_v13  ;;  %v882_v60 = vpack.c.bf16 %v3128_v15, %v3128_v15  ;;  %v1435_v24 = vpop.f32.mrf.mxu1  ;;  %1602 = vmatpush.bf16.msra.mxu2 %v1593_v46  ;;  %1621 = vmatpush.bf16.msrb.mxu3 %v1612_v20  ;;  %v2895_v46 = vld [vmem:[%s3715_s9 + $0x30] sm:$0xff]  ;;  %v2894_v20 = vld [vmem:[%s3715_s9 + $0x28] sm:$0xff] }
 0x344   : > { %v2892_v24 = vld [vmem:[%s3715_s9 + $0x18] sm:$0xff] }
 0x345   : > { %v1669_v1 = vsel %vm1401_vm2, %v882_v60, 0  ;;  %v1688_v11 = vsel %vm1401_vm2, %v883_v16, 0  ;;  %v2896_v60 = vld [vmem:[%s3715_s9 + $0x38] sm:$0xff] }
 0x346   : > { %2691 = vmatmul.msk.bf16.vlgmr.msra.gmra.mxu2 %vm1205_vm1, %v1392_v25  ;;  %2692 = vmatmul.msk.bf16.vlgmr.msrb.gmra.mxu3 %vm1205_vm1, %v1393_v22  ;;  %v2893_v22 = vld [vmem:[%s3715_s9 + $0x20] sm:$0xff]  ;;  %v2891_v25 = vld [vmem:[%s3715_s9 + $0x10] sm:$0xff] }
 0x347   : > { %1678 = vmatpush.bf16.msrb.mxu2 %v1669_v1  ;;  %1697 = vmatpush.bf16.msra.mxu3 %v1688_v11  ;;  %v4063_v26 = vpop.f32.mrf.mxu3  ;;  %v2890_v1 = vld [vmem:[%s3715_s9 + $0x8] sm:$0xff]  ;;  %v2889_v11 = vld [vmem:[%s3715_s9] sm:$0xff] }
 0x349   : > { %v4065_v56 = vpop.f32.mrf.mxu2 }
 0x34a   : > { %v3122_v28 = vpop.permute.xlu1 %3121 }
 0x34b   : > { %v3124_v48 = vunpack.i.h.bf16 %v3122_v28  ;;  %v3123_v51 = vunpack.i.l.bf16 %v3122_v28 }
 0x34d   : > { %v881_v36 = vpack.c.bf16 %v3124_v48, %v3124_v48  ;;  %v880_v61 = vpack.c.bf16 %v3123_v51, %v3123_v51 }
 0x34f   : > { %v1473_v2 = vpop.f32.mrf.mxu3  ;;  %v1631_v37 = vsel %vm1401_vm2, %v880_v61, 0  ;;  %v1650_v29 = vsel %vm1401_vm2, %v881_v36, 0 }
 0x350   : > { %1640 = vmatpush.bf16.msra.mxu0 %v1631_v37  ;;  %1659 = vmatpush.bf16.msra.mxu1 %v1650_v29 }
 0x351   : > { %v1454_v40 = vpop.f32.mrf.mxu2 }
 0x353   : > { %2693 = vmatmul.msk.bf16.vlgmr.msra.gmra.mxu0 %vm1205_vm1, %v1394_v39 }
 0x354   : > { %1831 = vmatpush.bf16.msrb.mxu0 %v2896_v60 }
 0x356   : > { %2695 = vmatmul.msk.bf16.vlgmr.msrb.gmra.mxu2 %vm1205_vm1, %v1396_v42  ;;  %2696 = vmatmul.msk.bf16.vlgmr.msra.gmra.mxu3 %vm1205_vm1, %v1397_v41 }
 0x358   : > { %1832 = vmatpush.bf16.msrb.mxu0 %v2895_v46 }
 0x35c   : > { %1833 = vmatpush.bf16.msrb.mxu0 %v2894_v20 }
 0x360   : > { %1834 = vmatpush.bf16.msrb.mxu0 %v2893_v22 }
 0x364   : > { %1835 = vmatpush.bf16.msrb.mxu0 %v2892_v24 }
 0x368   : > { %v1343_v63 = vpop.xlane.xlu0 %1342  ;;  %1836 = vmatpush.bf16.msrb.mxu0 %v2891_v25 }
 0x369   : > { %3222 = vrcp.f32 %v1343_v63 }
 0x36c   : > { %1837 = vmatpush.bf16.msrb.mxu0 %v2890_v1 }
 0x36f   : > { %v3223_v8 = vpop.eup %3222 }
 0x370   : > { %v1379_v43 = vmul.f32 %v3223_v8, %v4035_v30  ;;  %1838 = vmatpush.bf16.msrb.mxu0 %v2889_v11 }
 0x372   : > { %v1395_v7 = vpack.c.bf16 %v1379_v43, %v1379_v43 }
 0x374   : > { %2694 = vmatmul.msk.bf16.vlgmr.msra.gmra.mxu1 %vm1205_vm1, %v1395_v7 }
 0x37b   : > { %v1490_v32 = vpop.f32.mrf.mxu0 }
 0x383   : > { %v1492_v0 = vpop.f32.mrf.mxu0 }
 0x38d   : > { %v1566_v17 = vpop.f32.mrf.mxu0 }
 0x395   : > { %v1509_v23 = vpop.f32.mrf.mxu1  ;;  %v1568_v49 = vpop.f32.mrf.mxu0 }
 0x396   : > { %v3130_v19 = vpack.i.bf16 %v1509_v23, %v1490_v32 }
 0x398   : > { %3131 = vrot.lane.b32.xlu1 %v3130_v19, %s3531_s21 }
 0x39d   : > { %v1511_v52 = vpop.f32.mrf.mxu1 }
 0x3a3   : > { %v1547_v21 = vpop.f32.mrf.mxu3 }
 0x3ab   : > { %v1549_v14 = vpop.f32.mrf.mxu3 }
 0x3ac   : > { %v480_v14 = vld [vmem:[%s3725_s19 + $0x2] ss:$0 sm:$0xff] }
 0x3b1   : > { %v1528_v53 = vpop.f32.mrf.mxu2 }
 0x3b2   : > { %v3145_v57 = vpack.i.bf16 %v1547_v21, %v1528_v53 }
 0x3b3   : > { %v1585_v54 = vpop.f32.mrf.mxu1 }
 0x3b4   : > { %v3135_v33 = vpack.i.bf16 %v1585_v54, %v1566_v17  ;;  %v3242_v54 = vld [vmem:[#allocation2 + $0x10] sm:$0xff] }
 0x3b6   : > { %3136 = vrot.lane.b32.xlu1 %v3135_v33, %s3530_s8 }
 0x3b9   : > { %v1530_v30 = vpop.f32.mrf.mxu2 }
 0x3bb   : > { %v1587_v55 = vpop.f32.mrf.mxu1 }
 0x3bc   : > { %v3243_v55 = vld [vmem:[#allocation2] sm:$0xff] }
 0x3be   : > { %3146 = vrot.lane.b32.xlu1 %v3145_v57, %s3531_s21 }
 0x3c9   : > { %v1604_v35 = vpop.f32.mrf.mxu2  ;;  %v1623_v58 = vpop.f32.mrf.mxu3 }
 0x3ca   : > { %v3150_v59 = vpack.i.bf16 %v1623_v58, %v1604_v35 }
 0x3cc   : > { %3151 = vrot.lane.b32.xlu2 %v3150_v59, %s3530_s8  ;;  %v3244_v59 = vld [vmem:[#allocation2 + $0x18] sm:$0xff] }
 0x3d0   : > { %v1642_v50 = vpop.f32.mrf.mxu0 }
 0x3d1   : > { %v1606_v4 = vpop.f32.mrf.mxu2  ;;  %v1625_v5 = vpop.f32.mrf.mxu3 }
 0x3d8   : > { %v1644_v6 = vpop.f32.mrf.mxu0 }
 0x3d9   : > { %v1680_v45 = vpop.f32.mrf.mxu2  ;;  %v1699_v47 = vpop.f32.mrf.mxu3  ;;  %v3245_v6 = vld [vmem:[#allocation2 + $0x8] sm:$0xff] }
 0x3da   : > { %v3155_v9 = vpack.i.bf16 %v1699_v47, %v1680_v45  ;;  %v3532_v47 = vmov 128.0  }
 0x3db   : > { %3224 = vrcp.f32 %v3532_v47 }
 0x3dc   : > { %3156 = vrot.lane.b32.xlu1 %v3155_v9, %s3529_s29 }
 0x3e1   : > { %v1682_v18 = vpop.f32.mrf.mxu2  ;;  %v1701_v12 = vpop.f32.mrf.mxu3 }
 0x3e2   : > { %v3225_v9 = vpop.eup %3224 }
 0x3e3   : > { %v1863_v18 = vmul.f32 128.0, %v3225_v9  ;;  %vm1867_vm5 = vweird.f32 %v3225_v9 }
 0x3e5   : > { %v1864_v12 = vsub.f32 1.0, %v1863_v18 }
 0x3f1   : > { %v1661_v13 = vpop.f32.mrf.mxu1 }
 0x3f2   : > { %v3140_v15 = vpack.i.bf16 %v1661_v13, %v1642_v50  ;;  %v1865_v13 = vmul.f32 %v3225_v9, %v1864_v12  ;;  %v2731_v12 = vld [vmem:[%s3717_s18] sm:$0xf] }
 0x3f4   : > { %3141 = vrot.lane.b32.xlu0 %v3140_v15, %s3529_s29  ;;  %v1866_v15 = vadd.f32 %v3225_v9, %v1865_v13  ;;  %v2898_v13 = vld [vmem:[%s3717_s18 + $0x4] sm:$0xf0] }
 0x3f9   : > { %v1663_v16 = vpop.f32.mrf.mxu1 }
 0x3fa   : > { %v4108_v16 = vsel %vm1867_vm5, %v3225_v9, %v1866_v15  ;;  %v2897_v15 = vld [vmem:[%s3717_s18 + $0x4] sm:$0xf] }
 0x40a   : > { %v3132_v27 = vpop.permute.xlu1 %3131 }
 0x40b   : > { %v3134_v48 = vunpack.i.h.bf16 %v3132_v27  ;;  %v3133_v51 = vunpack.i.l.bf16 %v3132_v27 }
 0x40d   : > { %v1752_v36 = vsel %vm884_vm0, %v4053_v62, %v3134_v48  ;;  %v1751_v61 = vsel %vm884_vm0, %v4046_v44, %v3133_v51 }
 0x426   : > { %v3152_v8 = vpop.permute.xlu2 %3151 }
 0x427   : > { %v3154_v0 = vunpack.i.h.bf16 %v3152_v8  ;;  %v3153_v17 = vunpack.i.l.bf16 %v3152_v8  ;;  %v2771_v8 = vld [vmem:[%s3717_s18 + $0x50] sm:$0xf] }
 0x428   : > { %v3137_v28 = vpop.permute.xlu1 %3136 }
 0x429   : > { %v3139_v31 = vunpack.i.h.bf16 %v3137_v28  ;;  %v3138_v3 = vunpack.i.l.bf16 %v3137_v28 }
 0x42b   : > { %v1756_v29 = vsel %vm1755_vm3, %v1751_v61, %v3138_v3  ;;  %v1757_v38 = vsel %vm1755_vm3, %v1752_v36, %v3139_v31  ;;  %v2787_v61 = vld [vmem:[%s3717_s18 + $0x70] sm:$0xf] }
 0x430   : > { %v3147_v10 = vpop.permute.xlu1 %3146 }
 0x431   : > { %v3149_v41 = vunpack.i.h.bf16 %v3147_v10  ;;  %v3148_v62 = vunpack.i.l.bf16 %v3147_v10 }
 0x433   : > { %v1754_v44 = vsel %vm884_vm0, %v4063_v26, %v3149_v41  ;;  %v1753_v43 = vsel %vm884_vm0, %v4065_v56, %v3148_v62  ;;  %v2781_v62 = vld [vmem:[%s3717_s18 + $0x68] sm:$0xf0] }
 0x434   : > { %v1758_v23 = vsel %vm1755_vm3, %v1753_v43, %v3153_v17  ;;  %v1759_v49 = vsel %vm1755_vm3, %v1754_v44, %v3154_v0  ;;  %v2908_v44 = vld [vmem:[%s3717_s18 + $0x54] sm:$0xf0]  ;;  %v2907_v43 = vld [vmem:[%s3717_s18 + $0x54] sm:$0xf]  ;;  %v2763_v17 = vld [vmem:[%s3717_s18 + $0x40] sm:$0xf] }
 0x44e   : > { %v3157_v63 = vpop.permute.xlu1 %3156 }
 0x44f   : > { %v3159_v7 = vunpack.i.h.bf16 %v3157_v63  ;;  %v3158_v32 = vunpack.i.l.bf16 %v3157_v63 }
 0x451   : > { %v1763_v19 = vsel %vm1760_vm4, %v1758_v23, %v3158_v32  ;;  %v1764_v52 = vsel %vm1760_vm4, %v1759_v49, %v3159_v7  ;;  %v2772_v7 = vor.u32 %v2908_v44, %v2771_v8  ;;  %v2773_v32 = vld [vmem:[%s3717_s18 + $0x58] sm:$0xf0]  ;;  %v2906_v23 = vld [vmem:[%s3717_s18 + $0x44] sm:$0xf0]  ;;  %v2905_v49 = vld [vmem:[%s3717_s18 + $0x44] sm:$0xf] }
 0x452   : > { %v1766_v21 = vpack.c.bf16 %v1764_v52, %v1763_v19  ;;  %v2776_v0 = vor.u32 %v2907_v43, %v2773_v32  ;;  %v2764_v19 = vor.u32 %v2906_v23, %v2763_v17  ;;  %v2765_v52 = vld [vmem:[%s3717_s18 + $0x48] sm:$0xf0]  ;;  %v2919_v44 = vld [vmem:[%s3723_s10 + $0x30] sm:$0xff] }
 0x453   : > { %v2927_v43 = vld [vmem:[%s3723_s10 + $0x70] sm:$0xff] }
 0x466   : > { %v3142_v34 = vpop.permute.xlu0 %3141 }
 0x467   : > { %v3144_v2 = vunpack.i.h.bf16 %v3142_v34  ;;  %v3143_v37 = vunpack.i.l.bf16 %v3142_v34 }
 0x469   : > { %v1762_v39 = vsel %vm1760_vm4, %v1757_v38, %v3144_v2  ;;  %v1761_v40 = vsel %vm1760_vm4, %v1756_v29, %v3143_v37  ;;  %v2912_v2 = vld [vmem:[%s3717_s18 + $0x74] sm:$0xf0]  ;;  %v2911_v37 = vld [vmem:[%s3717_s18 + $0x74] sm:$0xf]  ;;  %v2789_v38 = vld [vmem:[%s3717_s18 + $0x78] sm:$0xf0] }
 0x46a   : > { %v1765_v42 = vpack.c.bf16 %v1762_v39, %v1761_v40  ;;  %v2788_v29 = vor.u32 %v2912_v2, %v2787_v61  ;;  %v2792_v10 = vor.u32 %v2911_v37, %v2789_v38  ;;  %v2779_v39 = vld [vmem:[%s3717_s18 + $0x60] sm:$0xf]  ;;  %v2910_v40 = vld [vmem:[%s3717_s18 + $0x64] sm:$0xf0] }
 0x46b   : > { %v2780_v41 = vor.u32 %v2910_v40, %v2779_v39  ;;  %v2920_v40 = vld [vmem:[%s3723_s10 + $0x38] sm:$0xff] }
 0x46c   : > { %1839 = vmatmul.bf16.vlgmr.msrb.gmra.mxu0 %v1765_v42  ;;  %2052 = vmatpush.bf16.msrb.mxu1 %v2788_v29  ;;  %v2909_v42 = vld [vmem:[%s3717_s18 + $0x64] sm:$0xf] }
 0x46d   : > { %2071 = vmatpush.bf16.msra.mxu2 %v2792_v10  ;;  %v2784_v63 = vor.u32 %v2909_v42, %v2781_v62  ;;  %v2928_v42 = vld [vmem:[%s3723_s10 + $0x78] sm:$0xff]  ;;  %2230 = vmatpush.bf16.msrb.mxu3 %v2920_v40 }
 0x46e   : > { %2249 = vmatpush.bf16.msra.mxu0 %v2928_v42 }
 0x470   : > { %2053 = vmatpush.bf16.msrb.mxu1 %v2780_v41 }
 0x471   : > { %2072 = vmatpush.bf16.msra.mxu2 %v2784_v63  ;;  %2231 = vmatpush.bf16.msrb.mxu3 %v2919_v44 }
 0x472   : > { %2250 = vmatpush.bf16.msra.mxu0 %v2927_v43 }
 0x474   : > { %2054 = vmatpush.bf16.msrb.mxu1 %v2772_v7 }
 0x475   : > { %2073 = vmatpush.bf16.msra.mxu2 %v2776_v0 }
 0x478   : > { %2055 = vmatpush.bf16.msrb.mxu1 %v2764_v19  ;;  %v482_v19 = vld [vmem:[%s3725_s19 + $0x4] ss:$0 sm:$0xff] }
 0x47c   : > { %1844 = vmatmul.bf16.gmra.mxu0 %v1766_v21  ;;  %v2768_v21 = vor.u32 %v2905_v49, %v2765_v52  ;;  %v2918_v52 = vld [vmem:[%s3723_s10 + $0x28] sm:$0xff] }
 0x47d   : > { %2232 = vmatpush.bf16.msrb.mxu3 %v2918_v52 }
 0x47e   : > { %2074 = vmatpush.bf16.msra.mxu2 %v2768_v21  ;;  %v2926_v21 = vld [vmem:[%s3723_s10 + $0x68] sm:$0xff] }
 0x47f   : > { %2251 = vmatpush.bf16.msra.mxu0 %v2926_v21 }
 0x4e9   : > { %v1840_v53 = vpop.f32.mrf.mxu0 }
 0x4ea   : > { %v1841_v26 = vadd.f32 %v1840_v53, %v480_v14  ;;  %v2904_v53 = vld [vmem:[%s3717_s18 + $0x34] sm:$0xf0] }
 0x4ec   : > { %v1850_v33 = vadd.f32 %v3242_v54, %v1841_v26  ;;  %v2903_v26 = vld [vmem:[%s3717_s18 + $0x34] sm:$0xf] }
 0x4ee   : > { %1854 = vadd.xlane.f32.xlu2 %v1850_v33 }
 0x4f1   : > { %v1842_v56 = vpop.f32.mrf.mxu0 }
 0x4f2   : > { %v1843_v30 = vadd.f32 %v1842_v56, %v480_v14 }
 0x4f4   : > { %v1851_v57 = vadd.f32 %v3243_v55, %v1843_v30  ;;  %v2747_v30 = vld [vmem:[%s3717_s18 + $0x20] sm:$0xf]  ;;  %v2902_v55 = vld [vmem:[%s3717_s18 + $0x24] sm:$0xf0] }
 0x4f6   : > { %1856 = vadd.xlane.f32.xlu1 %v1851_v57 }
 0x4f9   : > { %v1845_v35 = vpop.f32.mrf.mxu0 }
 0x4fa   : > { %v1846_v58 = vadd.f32 %v1845_v35, %v480_v14  ;;  %v2748_v35 = vor.u32 %v2902_v55, %v2747_v30  ;;  %v2917_v30 = vld [vmem:[%s3723_s10 + $0x20] sm:$0xff] }
 0x4fb   : > { %2233 = vmatpush.bf16.msrb.mxu3 %v2917_v30 }
 0x4fc   : > { %v1852_v50 = vadd.f32 %v3244_v59, %v1846_v58  ;;  %v2749_v58 = vld [vmem:[%s3717_s18 + $0x28] sm:$0xf0] }
 0x4fe   : > { %1858 = vadd.xlane.f32.xlu0 %v1852_v50 }
 0x501   : > { %v1847_v4 = vpop.f32.mrf.mxu0 }
 0x502   : > { %v1848_v5 = vadd.f32 %v1847_v4, %v480_v14  ;;  %v2755_v14 = vld [vmem:[%s3717_s18 + $0x30] sm:$0xf]  ;;  %v2900_v4 = vld [vmem:[%s3717_s18 + $0x14] sm:$0xf0] }
 0x503   : > { %v2756_v54 = vor.u32 %v2904_v53, %v2755_v14 }
 0x504   : > { %v1853_v45 = vadd.f32 %v3245_v6, %v1848_v5  ;;  %v2899_v5 = vld [vmem:[%s3717_s18 + $0x14] sm:$0xf] }
 0x505   : > { %2056 = vmatpush.bf16.msrb.mxu1 %v2756_v54 }
 0x506   : > { %1860 = vadd.xlane.f32.xlu2 %v1853_v45 }
 0x509   : > { %2057 = vmatpush.bf16.msrb.mxu1 %v2748_v35 }
 0x561   : > { %v1855_v60 = vpop.xlane.xlu2 %1854 }
 0x562   : > { %v1869_v46 = vmul.f32 %v4108_v16, %v1855_v60 }
 0x564   : > { %v4111_v20 = vsub.f32 %v1850_v33, %v1869_v46  ;;  %v2757_v33 = vld [vmem:[%s3717_s18 + $0x38] sm:$0xf0]  ;;  %v2732_v46 = vor.u32 %v2898_v13, %v2731_v12 }
 0x565   : > { %v2760_v56 = vor.u32 %v2903_v26, %v2757_v33 }
 0x566   : > { %v1877_v22 = vmul.f32 %v4111_v20, %v4111_v20 }
 0x567   : > { %2075 = vmatpush.bf16.msra.mxu2 %v2760_v56 }
 0x568   : > { %1881 = vadd.xlane.f32.xlu1 %v1877_v22  ;;  %v2733_v22 = vld [vmem:[%s3717_s18 + $0x8] sm:$0xf0] }
 0x569   : > { %v1857_v24 = vpop.xlane.xlu1 %1856 }
 0x56a   : > { %v1870_v25 = vmul.f32 %v4108_v16, %v1857_v24  ;;  %v2736_v24 = vor.u32 %v2897_v15, %v2733_v22  ;;  %v2916_v22 = vld [vmem:[%s3723_s10 + $0x18] sm:$0xff] }
 0x56b   : > { %2234 = vmatpush.bf16.msrb.mxu3 %v2916_v22 }
 0x56c   : > { %v4116_v1 = vsub.f32 %v1851_v57, %v1870_v25  ;;  %v2901_v57 = vld [vmem:[%s3717_s18 + $0x24] sm:$0xf] }
 0x56d   : > { %v2752_v59 = vor.u32 %v2901_v57, %v2749_v58 }
 0x56e   : > { %v1878_v11 = vmul.f32 %v4116_v1, %v4116_v1 }
 0x56f   : > { %2076 = vmatpush.bf16.msra.mxu2 %v2752_v59 }
 0x570   : > { %1883 = vadd.xlane.f32.xlu2 %v1878_v11 }
 0x571   : > { %v1859_v27 = vpop.xlane.xlu0 %1858 }
 0x572   : > { %v1871_v28 = vmul.f32 %v4108_v16, %v1859_v27 }
 0x574   : > { %v4121_v48 = vsub.f32 %v1852_v50, %v1871_v28  ;;  %v2739_v50 = vld [vmem:[%s3717_s18 + $0x10] sm:$0xf] }
 0x575   : > { %v2740_v6 = vor.u32 %v2900_v4, %v2739_v50 }
 0x576   : > { %v1879_v51 = vmul.f32 %v4121_v48, %v4121_v48 }
 0x577   : > { %2058 = vmatpush.bf16.msrb.mxu1 %v2740_v6 }
 0x578   : > { %1885 = vadd.xlane.f32.xlu0 %v1879_v51 }
 0x579   : > { %v1861_v31 = vpop.xlane.xlu2 %1860 }
 0x57a   : > { %v1872_v3 = vmul.f32 %v4108_v16, %v1861_v31 }
 0x57b   : > { %2059 = vmatpush.bf16.msrb.mxu1 %v2732_v46 }
 0x57c   : > { %v4126_v34 = vsub.f32 %v1853_v45, %v1872_v3  ;;  %v2741_v45 = vld [vmem:[%s3717_s18 + $0x18] sm:$0xf0] }
 0x57d   : > { %v2744_v9 = vor.u32 %v2899_v5, %v2741_v45 }
 0x57e   : > { %v1880_v36 = vmul.f32 %v4126_v34, %v4126_v34 }
 0x57f   : > { %2077 = vmatpush.bf16.msra.mxu2 %v2744_v9 }
 0x580   : > { %1887 = vadd.xlane.f32.xlu1 %v1880_v36 }
 0x583   : > { %2078 = vmatpush.bf16.msra.mxu2 %v2736_v24  ;;  %v2925_v24 = vld [vmem:[%s3723_s10 + $0x60] sm:$0xff] }
 0x584   : > { %2252 = vmatpush.bf16.msra.mxu0 %v2925_v24 }
 0x5db   : > { %v1882_v47 = vpop.xlane.xlu1 %1881 }
 0x5dc   : > { %v1889_v18 = vmul.f32 %v1882_v47, %v4108_v16 }
 0x5de   : > { %v1893_v60 = vadd.f32 1e-05, %v1889_v18 }
 0x5e0   : > { %3226 = vrsqrt.f32 %v1893_v60  ;;  %vm1903_vm7 = vweird.f32 %v1893_v60 }
 0x5e3   : > { %v1884_v25 = vpop.xlane.xlu2 %1883 }
 0x5e4   : > { %v1890_v11 = vmul.f32 %v1884_v25, %v4108_v16  ;;  %v2924_v25 = vld [vmem:[%s3723_s10 + $0x58] sm:$0xff] }
 0x5e5   : > { %2253 = vmatpush.bf16.msra.mxu0 %v2924_v25 }
 0x5e6   : > { %v3227_v27 = vpop.eup %3226  ;;  %v1894_v28 = vadd.f32 1e-05, %v1890_v11  ;;  %v2914_v11 = vld [vmem:[%s3723_s10 + $0x8] sm:$0xff] }
 0x5e7   : > { %v1898_v51 = vmul.f32 %v3227_v27, %v1893_v60  ;;  %vm1904_vm6 = vweird.f32 %v3227_v27 }
 0x5e8   : > { %3228 = vrsqrt.f32 %v1894_v28  ;;  %vm1905_vm8 = vmor %vm1903_vm7, %vm1904_vm6  ;;  %vm1913_vm10 = vweird.f32 %v1894_v28 }
 0x5e9   : > { %v1899_v31 = vmul.f32 %v3227_v27, %v1898_v51  ;;  %v2922_v51 = vld [vmem:[%s3723_s10 + $0x48] sm:$0xff] }
 0x5eb   : > { %v1900_v3 = vmul.f32 0.5, %v1899_v31  ;;  %v1886_v36 = vpop.xlane.xlu0 %1885  ;;  %v2921_v31 = vld [vmem:[%s3723_s10 + $0x40] sm:$0xff] }
 0x5ec   : > { %v1891_v61 = vmul.f32 %v1886_v36, %v4108_v16 }
 0x5ed   : > { %v1901_v2 = vsub.f32 1.5, %v1900_v3  ;;  %v2568_v3 = vld [vmem:[%s3725_s19 + $0x1] ss:$8 sm:$0x3] }
 0x5ee   : > { %v3229_v37 = vpop.eup %3228  ;;  %v1895_v29 = vadd.f32 1e-05, %v1891_v61  ;;  %v1968_v61 = vperm.slane %v2568_v3, 0 }
 0x5ef   : > { %v1902_v38 = vmul.f32 %v3227_v27, %v1901_v2  ;;  %v1908_v10 = vmul.f32 %v3229_v37, %v1894_v28  ;;  %vm1914_vm9 = vweird.f32 %v3229_v37  ;;  %v2913_v28 = vld [vmem:[%s3723_s10] sm:$0xff] }
 0x5f0   : > { %3230 = vrsqrt.f32 %v1895_v29  ;;  %vm1915_vm11 = vmor %vm1913_vm10, %vm1914_vm9  ;;  %vm1923_vm13 = vweird.f32 %v1895_v29 }
 0x5f1   : > { %v1909_v39 = vmul.f32 %v3229_v37, %v1908_v10  ;;  %v1906_v41 = vsel %vm1905_vm8, %v3227_v27, %v1902_v38  ;;  %v2923_v27 = vld [vmem:[%s3723_s10 + $0x50] sm:$0xff]  ;;  %v1969_v38 = vperm.slane %v2568_v3, 1 }
 0x5f2   : > { %v1937_v0 = vmul.f32 %v1906_v41, %v4111_v20  ;;  %v483_v20 = vld [vmem:[%s3725_s19 + $0x5] ss:$0 sm:$0xff]  ;;  %2254 = vmatpush.bf16.msra.mxu0 %v2923_v27 }
 0x5f3   : > { %v1910_v62 = vmul.f32 0.5, %v1909_v39  ;;  %v1888_v63 = vpop.xlane.xlu1 %1887 }
 0x5f4   : > { %v1892_v8 = vmul.f32 %v1888_v63, %v4108_v16  ;;  %v1941_v54 = vmul.f32 %v1937_v0, %v482_v19 }
 0x5f5   : > { %v1911_v7 = vsub.f32 1.5, %v1910_v62 }
 0x5f6   : > { %v3231_v32 = vpop.eup %3230  ;;  %v1896_v17 = vadd.f32 1e-05, %v1892_v8  ;;  %v4177_v35 = vadd.f32 %v1941_v54, %v483_v20  ;;  %2255 = vmatpush.bf16.msra.mxu0 %v2922_v51 }
 0x5f7   : > { %v1912_v23 = vmul.f32 %v3229_v37, %v1911_v7  ;;  %v1918_v49 = vmul.f32 %v3231_v32, %v1895_v29  ;;  %vm1924_vm12 = vweird.f32 %v3231_v32 }
 0x5f8   : > { %3232 = vrsqrt.f32 %v1896_v17  ;;  %vm1925_vm14 = vmor %vm1923_vm13, %vm1924_vm12  ;;  %vm1933_vm0 = vweird.f32 %v1896_v17 }
 0x5f9   : > { %v1916_v14 = vsel %vm1915_vm11, %v3229_v37, %v1912_v23  ;;  %v1919_v53 = vmul.f32 %v3231_v32, %v1918_v49 }
 0x5fa   : > { %v1938_v26 = vmul.f32 %v1916_v14, %v4116_v1  ;;  %2256 = vmatpush.bf16.msra.mxu0 %v2921_v31 }
 0x5fb   : > { %v1920_v33 = vmul.f32 0.5, %v1919_v53 }
 0x5fc   : > { %v1942_v56 = vmul.f32 %v1938_v26, %v482_v19 }
 0x5fd   : > { %v1921_v55 = vsub.f32 1.5, %v1920_v33 }
 0x5fe   : > { %v3233_v57 = vpop.eup %3232  ;;  %v4179_v58 = vadd.f32 %v1942_v56, %v483_v20 }
 0x5ff   : > { %v1922_v59 = vmul.f32 %v3231_v32, %v1921_v55  ;;  %v1928_v50 = vmul.f32 %v3233_v57, %v1896_v17  ;;  %vm1934_vm15 = vweird.f32 %v3233_v57 }
 0x600   : > { %v1949_v4 = vpack.c.bf16 %v4179_v58, %v4177_v35  ;;  %vm1935_vm1 = vmor %vm1933_vm0, %vm1934_vm15 }
 0x601   : > { %v1929_v1 = vmul.f32 %v3233_v57, %v1928_v50  ;;  %v1926_v6 = vsel %vm1925_vm14, %v3231_v32, %v1922_v59 }
 0x602   : > { %2060 = vmatmul.bf16.vlgmr.msrb.gmra.mxu1 %v1949_v4  ;;  %2079 = vmatmul.bf16.vlgmr.msra.gmra.mxu2 %v1949_v4  ;;  %v1939_v47 = vmul.f32 %v1926_v6, %v4121_v48 }
 0x603   : > { %v1930_v5 = vmul.f32 0.5, %v1929_v1 }
 0x604   : > { %v1943_v13 = vmul.f32 %v1939_v47, %v482_v19 }
 0x605   : > { %v1931_v45 = vsub.f32 1.5, %v1930_v5 }
 0x606   : > { %v4185_v60 = vadd.f32 %v1943_v13, %v483_v20 }
 0x607   : > { %v1932_v9 = vmul.f32 %v3233_v57, %v1931_v45 }
 0x609   : > { %v1936_v18 = vsel %vm1935_vm1, %v3233_v57, %v1932_v9 }
 0x60a   : > { %v1940_v12 = vmul.f32 %v1936_v18, %v4126_v34  ;;  %v2915_v34 = vld [vmem:[%s3723_s10 + $0x10] sm:$0xff] }
 0x60b   : > { %2235 = vmatpush.bf16.msrb.mxu3 %v2915_v34 }
 0x60c   : > { %v1944_v15 = vmul.f32 %v1940_v12, %v482_v19 }
 0x60e   : > { %v4187_v46 = vadd.f32 %v1944_v15, %v483_v20  ;;  %v481_v20 = vld [vmem:[%s3725_s19 + $0x3] ss:$0 sm:$0xff] }
 0x60f   : > { %2236 = vmatpush.bf16.msrb.mxu3 %v2914_v11 }
 0x610   : > { %v1950_v48 = vpack.c.bf16 %v4187_v46, %v4185_v60 }
 0x612   : > { %2065 = vmatmul.bf16.gmra.mxu1 %v1950_v48  ;;  %2084 = vmatmul.bf16.gmra.mxu2 %v1950_v48 }
 0x613   : > { %2237 = vmatpush.bf16.msrb.mxu3 %v2913_v28 }
 0x67f   : > { %v2061_v36 = vpop.f32.mrf.mxu1 }
 0x680   : > { %v2062_v37 = vadd.f32 %v2061_v36, %v1968_v61 }
 0x682   : > { %v2090_v39 = vmax.f32 %v2062_v37, 0.0 }
 0x685   : > { %v2080_v2 = vpop.f32.mrf.mxu2 }
 0x686   : > { %v2081_v42 = vadd.f32 %v2080_v2, %v1969_v38 }
 0x687   : > { %v2063_v29 = vpop.f32.mrf.mxu1 }
 0x688   : > { %v2064_v10 = vadd.f32 %v2063_v29, %v1968_v61  ;;  %v2091_v44 = vmax.f32 %v2081_v42, 0.0 }
 0x68a   : > { %v2092_v40 = vmax.f32 %v2064_v10, 0.0 }
 0x68c   : > { %v2098_v41 = vpack.c.bf16 %v2092_v40, %v2090_v39 }
 0x68d   : > { %v2082_v62 = vpop.f32.mrf.mxu2 }
 0x68e   : > { %v2083_v63 = vadd.f32 %v2082_v62, %v1969_v38  ;;  %2238 = vmatmul.bf16.vlgmr.msrb.gmra.mxu3 %v2098_v41 }
 0x68f   : > { %v2066_v8 = vpop.f32.mrf.mxu1 }
 0x690   : > { %v2093_v43 = vmax.f32 %v2083_v63, 0.0  ;;  %v2067_v0 = vadd.f32 %v2066_v8, %v1968_v61 }
 0x692   : > { %v2099_v7 = vpack.c.bf16 %v2093_v43, %v2091_v44  ;;  %v2094_v49 = vmax.f32 %v2067_v0, 0.0 }
 0x694   : > { %2257 = vmatmul.bf16.vlgmr.msra.gmra.mxu0 %v2099_v7 }
 0x695   : > { %v2085_v32 = vpop.f32.mrf.mxu2 }
 0x696   : > { %v2086_v52 = vadd.f32 %v2085_v32, %v1969_v38 }
 0x697   : > { %v2068_v17 = vpop.f32.mrf.mxu1 }
 0x698   : > { %v2069_v23 = vadd.f32 %v2068_v17, %v1968_v61  ;;  %v2095_v26 = vmax.f32 %v2086_v52, 0.0 }
 0x69a   : > { %v2096_v19 = vmax.f32 %v2069_v23, 0.0 }
 0x69c   : > { %v2100_v21 = vpack.c.bf16 %v2096_v19, %v2094_v49  ;;  %v484_v49 = vld [vmem:[%s3725_s19 + $0x6] ss:$0 sm:$0xff] }
 0x69d   : > { %v2087_v14 = vpop.f32.mrf.mxu2 }
 0x69e   : > { %v2088_v53 = vadd.f32 %v2087_v14, %v1969_v38  ;;  %2243 = vmatmul.bf16.gmra.mxu3 %v2100_v21  ;;  %v485_v14 = vld [vmem:[%s3725_s19 + $0x7] ss:$0 sm:$0xff] }
 0x6a0   : > { %v2097_v54 = vmax.f32 %v2088_v53, 0.0 }
 0x6a2   : > { %v2101_v33 = vpack.c.bf16 %v2097_v54, %v2095_v26 }
 0x6a4   : > { %2262 = vmatmul.bf16.gmra.mxu0 %v2101_v33 }
 0x711   : > { %v2239_v56 = vpop.f32.mrf.mxu3  ;;  %v2258_v30 = vpop.f32.mrf.mxu0 }
 0x712   : > { %v2240_v55 = vadd.f32 %v2239_v56, %v481_v20 }
 0x714   : > { %v2259_v57 = vadd.f32 %v2258_v30, %v2240_v55 }
 0x716   : > { %v2268_v59 = vadd.f32 %v2259_v57, %v4177_v35 }
 0x718   : > { %2272 = vadd.xlane.f32.xlu2 %v2268_v59 }
 0x719   : > { %v2241_v50 = vpop.f32.mrf.mxu3  ;;  %v2260_v4 = vpop.f32.mrf.mxu0 }
 0x71a   : > { %v2242_v1 = vadd.f32 %v2241_v50, %v481_v20 }
 0x71c   : > { %v2261_v5 = vadd.f32 %v2260_v4, %v2242_v1 }
 0x71e   : > { %v2269_v6 = vadd.f32 %v2261_v5, %v4179_v58 }
 0x720   : > { %2274 = vadd.xlane.f32.xlu0 %v2269_v6 }
 0x721   : > { %v2244_v45 = vpop.f32.mrf.mxu3  ;;  %v2263_v47 = vpop.f32.mrf.mxu0 }
 0x722   : > { %v2245_v9 = vadd.f32 %v2244_v45, %v481_v20 }
 0x724   : > { %v2264_v18 = vadd.f32 %v2263_v47, %v2245_v9 }
 0x726   : > { %v2270_v12 = vadd.f32 %v2264_v18, %v4185_v60 }
 0x728   : > { %2276 = vadd.xlane.f32.xlu1 %v2270_v12 }
 0x729   : > { %v2246_v13 = vpop.f32.mrf.mxu3  ;;  %v2265_v48 = vpop.f32.mrf.mxu0 }
 0x72a   : > { %v2247_v15 = vadd.f32 %v2246_v13, %v481_v20 }
 0x72c   : > { %v2266_v22 = vadd.f32 %v2265_v48, %v2247_v15 }
 0x72e   : > { %v2271_v35 = vadd.f32 %v2266_v22, %v4187_v46 }
 0x730   : > { %2278 = vadd.xlane.f32.xlu2 %v2271_v35 }
 0x78b   : > { %v2273_v24 = vpop.xlane.xlu2 %2272 }
 0x78c   : > { %v2280_v34 = vmul.f32 %v2273_v24, %v4108_v16 }
 0x78e   : > { %v2284_v25 = vsub.f32 %v2268_v59, %v2280_v34 }
 0x790   : > { %v2288_v58 = vmul.f32 %v2284_v25, %v2284_v25 }
 0x792   : > { %2292 = vadd.xlane.f32.xlu0 %v2288_v58 }
 0x793   : > { %v2275_v11 = vpop.xlane.xlu0 %2274 }
 0x794   : > { %v2281_v27 = vmul.f32 %v2275_v11, %v4108_v16 }
 0x796   : > { %v2285_v28 = vsub.f32 %v2269_v6, %v2281_v27 }
 0x798   : > { %v2289_v51 = vmul.f32 %v2285_v28, %v2285_v28 }
 0x79a   : > { %2294 = vadd.xlane.f32.xlu1 %v2289_v51 }
 0x79b   : > { %v2277_v60 = vpop.xlane.xlu1 %2276 }
 0x79c   : > { %v2282_v31 = vmul.f32 %v2277_v60, %v4108_v16 }
 0x79e   : > { %v4209_v3 = vsub.f32 %v2270_v12, %v2282_v31 }
 0x7a0   : > { %v2290_v46 = vmul.f32 %v4209_v3, %v4209_v3 }
 0x7a2   : > { %2296 = vadd.xlane.f32.xlu2 %v2290_v46 }
 0x7a3   : > { %v2279_v36 = vpop.xlane.xlu2 %2278 }
 0x7a4   : > { %v2283_v61 = vmul.f32 %v2279_v36, %v4108_v16 }
 0x7a6   : > { %v4214_v2 = vsub.f32 %v2271_v35, %v2283_v61 }
 0x7a8   : > { %v2291_v37 = vmul.f32 %v4214_v2, %v4214_v2 }
 0x7aa   : > { %2298 = vadd.xlane.f32.xlu0 %v2291_v37 }
 0x805   : > { %v2293_v29 = vpop.xlane.xlu0 %2292 }
 0x806   : > { %v2300_v38 = vmul.f32 %v2293_v29, %v4108_v16 }
 0x808   : > { %v2304_v10 = vadd.f32 1e-05, %v2300_v38 }
 0x80a   : > { %3234 = vrsqrt.f32 %v2304_v10  ;;  %vm2314_vm3 = vweird.f32 %v2304_v10 }
 0x80d   : > { %v2295_v39 = vpop.xlane.xlu1 %2294 }
 0x80e   : > { %v2301_v40 = vmul.f32 %v2295_v39, %v4108_v16 }
 0x810   : > { %v3235_v42 = vpop.eup %3234  ;;  %v2305_v41 = vadd.f32 1e-05, %v2301_v40 }
 0x811   : > { %v2309_v62 = vmul.f32 %v3235_v42, %v2304_v10  ;;  %vm2315_vm2 = vweird.f32 %v3235_v42 }
 0x812   : > { %3236 = vrsqrt.f32 %v2305_v41  ;;  %vm2316_vm4 = vmor %vm2314_vm3, %vm2315_vm2  ;;  %vm2324_vm6 = vweird.f32 %v2305_v41 }
 0x813   : > { %v2310_v63 = vmul.f32 %v3235_v42, %v2309_v62 }
 0x815   : > { %v2311_v8 = vmul.f32 0.5, %v2310_v63  ;;  %v2297_v44 = vpop.xlane.xlu2 %2296 }
 0x816   : > { %v2302_v43 = vmul.f32 %v2297_v44, %v4108_v16 }
 0x817   : > { %v2312_v7 = vsub.f32 1.5, %v2311_v8 }
 0x818   : > { %v3237_v32 = vpop.eup %3236  ;;  %v2306_v0 = vadd.f32 1e-05, %v2302_v43 }
 0x819   : > { %v2313_v17 = vmul.f32 %v3235_v42, %v2312_v7  ;;  %v2319_v23 = vmul.f32 %v3237_v32, %v2305_v41  ;;  %vm2325_vm5 = vweird.f32 %v3237_v32 }
 0x81a   : > { %3238 = vrsqrt.f32 %v2306_v0  ;;  %vm2326_vm7 = vmor %vm2324_vm6, %vm2325_vm5  ;;  %vm2334_vm9 = vweird.f32 %v2306_v0 }
 0x81b   : > { %v2317_v19 = vsel %vm2316_vm4, %v3235_v42, %v2313_v17  ;;  %v2320_v52 = vmul.f32 %v3237_v32, %v2319_v23 }
 0x81c   : > { %v2348_v21 = vmul.f32 %v2317_v19, %v2284_v25 }
 0x81d   : > { %v2321_v53 = vmul.f32 0.5, %v2320_v52  ;;  %v2299_v26 = vpop.xlane.xlu0 %2298 }
 0x81e   : > { %v2352_v54 = vmul.f32 %v2348_v21, %v484_v49  ;;  %v2303_v33 = vmul.f32 %v2299_v26, %v4108_v16 }
 0x81f   : > { %v2322_v20 = vsub.f32 1.5, %v2321_v53 }
 0x820   : > { %v3239_v56 = vpop.eup %3238  ;;  %v2356_v30 = vadd.f32 %v2352_v54, %v485_v14  ;;  %v2307_v55 = vadd.f32 1e-05, %v2303_v33 }
 0x821   : > { %v2323_v57 = vmul.f32 %v3237_v32, %v2322_v20  ;;  %v2329_v59 = vmul.f32 %v3239_v56, %v2306_v0  ;;  %vm2335_vm8 = vweird.f32 %v3239_v56 }
 0x822   : > { %2360 = vst [vmem:[#allocation2 + $0x10] sm:$0xff] %v2356_v30  ;;  %3240 = vrsqrt.f32 %v2307_v55  ;;  %vm2336_vm10 = vmor %vm2334_vm9, %vm2335_vm8  ;;  %vm2344_vm12 = vweird.f32 %v2307_v55 }
 0x823   : > { %v2327_v50 = vsel %vm2326_vm7, %v3237_v32, %v2323_v57  ;;  %v2330_v4 = vmul.f32 %v3239_v56, %v2329_v59 }
 0x824   : > { %v2349_v1 = vmul.f32 %v2327_v50, %v2285_v28 }
 0x825   : > { %v2331_v5 = vmul.f32 0.5, %v2330_v4 }
 0x826   : > { %v2353_v6 = vmul.f32 %v2349_v1, %v484_v49 }
 0x827   : > { %v2332_v45 = vsub.f32 1.5, %v2331_v5 }
 0x828   : > { %v3241_v47 = vpop.eup %3240  ;;  %v2357_v16 = vadd.f32 %v2353_v6, %v485_v14 }
 0x829   : > { %v2333_v9 = vmul.f32 %v3239_v56, %v2332_v45  ;;  %v2339_v18 = vmul.f32 %v3241_v47, %v2307_v55  ;;  %vm2345_vm11 = vweird.f32 %v3241_v47 }
 0x82a   : > { %2361 = vst [vmem:[#allocation2] sm:$0xff] %v2357_v16  ;;  %vm2346_vm13 = vmor %vm2344_vm12, %vm2345_vm11 }
 0x82b   : > { %v2337_v12 = vsel %vm2336_vm10, %v3239_v56, %v2333_v9  ;;  %v2340_v13 = vmul.f32 %v3241_v47, %v2339_v18 }
 0x82c   : > { %v2350_v15 = vmul.f32 %v2337_v12, %v4209_v3 }
 0x82d   : > { %v2341_v48 = vmul.f32 0.5, %v2340_v13 }
 0x82e   : > { %v2354_v22 = vmul.f32 %v2350_v15, %v484_v49 }
 0x82f   : > { %v2342_v35 = vsub.f32 1.5, %v2341_v48 }
 0x830   : > { %v2358_v24 = vadd.f32 %v2354_v22, %v485_v14 }
 0x831   : > { %v2343_v34 = vmul.f32 %v3241_v47, %v2342_v35 }
 0x832   : > { %2362 = vst [vmem:[#allocation2 + $0x18] sm:$0xff] %v2358_v24 }
 0x833   : > { %v2347_v25 = vsel %vm2346_vm13, %v3241_v47, %v2343_v34 }
 0x834   : > { %v2351_v58 = vmul.f32 %v2347_v25, %v4214_v2 }
 0x836   : > { %v2355_v11 = vmul.f32 %v2351_v58, %v484_v49  ;;  %2367 = sbr.rel (%p2857_p2) target bundleno = 2111 (0x83f), region = 76 }
 0x838   : > { %v2359_v27 = vadd.f32 %v2355_v11, %v485_v14 }
 0x83a   : > { %2363 = vst [vmem:[#allocation2 + $0x8] sm:$0xff] %v2359_v27 }
 0x83b   : > { %2368 = vst [vmem:[#allocation14] sm:$0xff] %v2356_v30 }
 0x83c   : > { %2369 = vst [vmem:[#allocation14 + $0x8] sm:$0xff] %v2357_v16 }
 0x83d   : > { %2370 = vst [vmem:[#allocation14 + $0x10] sm:$0xff] %v2358_v24 }
 0x83e   : > { %2371 = vst [vmem:[#allocation14 + $0x18] sm:$0xff] %v2359_v27 }
 0x83f PF: > { %p2976_p3 = scmp.eq.s32.totalorder %s3653_s30, 1  ;;  %s2382_s20 = sshll.u32 %s4255_s6, 4  ;;  %s2383_s20 = int_to_ptr.hbm [resolvable:$true] %s2382_s20 }
 0x840   : > { %s3533_s14 = smov [#allocation14]   ;;  %s3534_s13 = smov 128  }
 0x841   : > { %s2380_s17 = sshll.u32 %s3533_s14, 4  ;;  %s3535_s4 = smov 8   ;;  %s2381_s17 = int_to_ptr.vmem [resolvable:$true] %s2380_s17 }
 0x842   : > { %2950 = dma.vmem_to_hbm [thread:$0]  (%p2976_p3), %s2381_s17, 512, %s2383_s20, [#allocation5], %s3534_s13, %s3534_s13, %s3535_s4  }
 0x843   : > { %3495 = dma.done.wait (%p2976_p3), [#allocation5], 512  }
 0x844   : > { %3497 = vsyncadd (%p2976_p3), [#allocation5], 4294966784 }
 0x845 PF: > { %s27_s26 = sadd.s32 1, %s3520_s26   ;;  %s4278_s24 = sld [smem:[#allocation20_spill]] }
 0x846   : > { %p24_p4 = scmp.ge.s32.totalorder %s27_s26, 4   ;;  %s4279_s23 = sld [smem:[#allocation22_spill]] }
 0x847   : > { %s4280_s30 = sld [smem:[#allocation21_spill]]  ;;  %s4281_s21 = smov %s3504_s22 }
 0x849   :  { %26 = sbr.rel (!%p24_p4) target bundleno = 16 (0x10), region = 145 }
 0x84b   : > { %s4282_s22 = smov %s4278_s24  ;;  %s4283_s24 = smov %s3516_s25 }
 0x84d   : > { %s4284_s25 = smov %s4280_s30 }
 0x84e   :  { %2399 = vsyncpa [#allocation4], 1 }
 0x84f   :  { %2401 = vsyncpa [#allocation4 + $0x1], 1 }
 0x850   :  { %2402 = vsyncpa [#allocation7], 1 }
 0x851   :  { %2404 = vsyncpa [#allocation7 + $0x1], 1 }
 0x852   :  { %2405 = vsyncpa [#allocation10], 1 }
 0x853   :  { %2407 = vsyncpa [#allocation10 + $0x1], 1 }
 0x854   :  { %2408 = vsyncpa [#allocation13], 1 }
 0x855   :  { %2410 = vsyncpa [#allocation13 + $0x1], 1 }
 0x856   :  { %2411 = vsyncpa [#allocation5], 1 }
 0x857   :  { %2413 = vsyncpa [#allocation5 + $0x1], 1 }

</bundles_post_ra>
